<compile_context>
chip_gen: v6e
topology: v6e:2x2x1
jax: 0.10.0
libtpu: 0.0.40
codegen_flags: <defaults>
</compile_context>

<pallas_src>
from functools import partial

import numpy as np
import jax
import jax.numpy as jnp
from jax.experimental import pallas as pl
from jax.experimental.pallas import tpu as pltpu

NUM_HEADS = 4
LN_EPS = 1e-5


def layer_scale_block_kernel(
    x_ref,
    ln1_g_ref, ln1_b_ref,
    w_qkv_ref,
    w_pl_t_ref, b_pl_ref, w_pw_t_ref, b_pw_ref,   # talking-heads mixers (VMEM, pre-T)
    w_proj_ref, b_proj_ref,
    ln2_g_ref, ln2_b_ref,
    w_fc1_ref, b_fc1_ref, w_fc2_ref, b_fc2_ref,
    gamma1_ref,
    o_ref,
    attn_acc_ref,                                  # VMEM scratch (N, C) f32
    *, num_heads, eps, q_tile):
    f32 = jnp.float32
    bf16 = jnp.bfloat16

    x = x_ref[0]                      # (N, C) f32
    N, C = x.shape
    H = num_heads
    D = C // H

    def layernorm(v, g, b):
        mu = jnp.mean(v, axis=-1, keepdims=True)
        var = jnp.mean((v - mu) ** 2, axis=-1, keepdims=True)
        return (v - mu) * jax.lax.rsqrt(var + eps) * g + b

    # ---------------- attention branch: x + attn(norm1(x)) ----------------
    xn = layernorm(x, ln1_g_ref[...], ln1_b_ref[...])

    # One big MXU matmul for Q/K/V (bf16 operands, f32 accumulation).  The 1/sqrt(D)
    # attention scale is already folded into the q-columns of w_qkv in the wrapper.
    qkv = jnp.dot(xn.astype(bf16), w_qkv_ref[...],
                  preferred_element_type=f32)                               # (N, 3C) f32
    q = qkv[:, 0:C]
    k = qkv[:, C:2 * C]
    v = qkv[:, 2 * C:3 * C]

    # Head split with ONE layout-aware relayout (reshape + einshape) instead of H
    # lane-offset slices + stack.  K/V stay resident (head-major) for all N keys.
    kh = pltpu.einshape('nhd->hnd', k.reshape(N, H, D)).astype(bf16)        # (H, N, D)
    vh = pltpu.einshape('nhd->hnd', v.reshape(N, H, D)).astype(bf16)        # (H, N, D)

    w_pl_t = w_pl_t_ref[...]          # (H, H) f32, transposed in the wrapper
    b_pl = b_pl_ref[...]              # (H, 1) f32
    w_pw_t = w_pw_t_ref[...]
    b_pw = b_pw_ref[...]

    # Query-block tiling: only (H, Tq, Nk) score/prob temporaries are live per tile
    # (talking-heads mixing is over heads, not keys, so the tiling is exact).  At the
    # toy shapes this is a single tile; at real dims it bounds VMEM to ~a few MB.
    for q0 in range(0, N, q_tile):
        tq = min(q_tile, N - q0)
        qt = q[q0:q0 + tq, :]                                               # (tq, C)
        qh = pltpu.einshape('nhd->hnd', qt.reshape(tq, H, D)).astype(bf16)  # (H, tq, D)

        # Head-batched score matmul on the MXU.
        scores = jnp.einsum('hqd,hkd->hqk', qh, kh,
                            preferred_element_type=f32)                     # (H, tq, N)

        # Talking heads (pre-softmax): mix heads with a small MXU matmul over the
        # flattened (tq*N) minor axis instead of an H^2 VPU loop.
        s2 = scores.reshape(H, tq * N)
        m2 = jnp.dot(w_pl_t, s2, preferred_element_type=f32) + b_pl         # (H, tq*N)
        m3 = m2.reshape(H, tq, N)

        # Softmax over keys; denominator reciprocal on the EUP (approx, ~free slot).
        mx = jnp.max(m3, axis=-1, keepdims=True)
        e = jnp.exp(m3 - mx)
        p3 = e * pl.reciprocal(jnp.sum(e, axis=-1, keepdims=True), approx=True)

        # Talking heads (post-softmax): same MXU mixing.
        p2 = p3.reshape(H, tq * N)
        a2 = jnp.dot(w_pw_t, p2, preferred_element_type=f32) + b_pw
        a3 = a2.reshape(H, tq, N).astype(bf16)

        # Head-batched attn @ v, then ONE relayout back to the lane-dense (tq, C) slab.
        oh = jnp.einsum('hqk,hkd->hqd', a3, vh,
                        preferred_element_type=f32)                         # (H, tq, D)
        attn_acc_ref[q0:q0 + tq, :] = pltpu.einshape('hnd->nhd', oh).reshape(tq, C)

    attn_out = jnp.dot(attn_acc_ref[...].astype(bf16), w_proj_ref[...],
                       preferred_element_type=f32) + b_proj_ref[...]

    x1 = x + attn_out

    # ---------------- MLP branch: x1 + gamma_1 * mlp(norm2(x1)) ----------------
    xn2 = layernorm(x1, ln2_g_ref[...], ln2_b_ref[...])
    hdn = jnp.dot(xn2.astype(bf16), w_fc1_ref[...],
                  preferred_element_type=f32) + b_fc1_ref[...]
    # TODO(synk): PyTorch nn.GELU default is the exact erf form; tanh approximation used
    # here for robust Mosaic lowering (EUP tanh).
    hdn = jax.nn.gelu(hdn, approximate=True)
    mlp_out = jnp.dot(hdn.astype(bf16), w_fc2_ref[...],
                      preferred_element_type=f32) + b_fc2_ref[...]

    o_ref[0] = x1 + gamma1_ref[...] * mlp_out


def layer_scale_block(x, p, num_heads=NUM_HEADS):
    B, N, C = x.shape
    D = C // num_heads
    q_tile = min(N, 128)

    kernel = partial(layer_scale_block_kernel, num_heads=num_heads, eps=LN_EPS,
                     q_tile=q_tile)

    f32 = jnp.float32
    bf16 = jnp.bfloat16

    # Fold the 1/sqrt(D) attention scale into the q-columns of w_qkv during the bf16
    # pre-cast (halves weight DMA bytes; MXU runs bf16 x bf16 -> f32).
    scale = D ** -0.5
    col_scale = jnp.concatenate(
        [jnp.full((C,), scale, f32), jnp.ones((2 * C,), f32)])[None, :]
    w_qkv = (p['w_qkv'] * col_scale).astype(bf16)
    w_proj = p['w_proj'].astype(bf16)
    w_fc1 = p['w_fc1'].astype(bf16)
    w_fc2 = p['w_fc2'].astype(bf16)

    # Talking-heads mixers: pre-transposed so the kernel computes mixed = w^T @ scores2d
    # on the MXU; kept as small f32 VMEM tiles.  Biases reshaped (H, 1) for broadcast.
    w_pl_t = p['w_pl'].T.astype(f32)
    w_pw_t = p['w_pw'].T.astype(f32)
    b_pl = p['b_pl'].reshape(num_heads, 1).astype(f32)
    b_pw = p['b_pw'].reshape(num_heads, 1).astype(f32)

    # Constant-index params never change across the (B,) grid: single-buffer them so
    # VMEM does not hold two copies of every weight (matters at real CaiT dims).
    def const_spec(arr):
        nd = arr.ndim
        return pl.BlockSpec(arr.shape, lambda b, _nd=nd: (0,) * _nd,
                            pipeline_mode=pl.Buffered(1))

    in_specs = [
        pl.BlockSpec((1, N, C), lambda b: (b, 0, 0)),   # x (double-buffered across b)
        const_spec(p['ln1_g']), const_spec(p['ln1_b']),
        const_spec(w_qkv),
        const_spec(w_pl_t), const_spec(b_pl), const_spec(w_pw_t), const_spec(b_pw),
        const_spec(w_proj), const_spec(p['b_proj']),
        const_spec(p['ln2_g']), const_spec(p['ln2_b']),
        const_spec(w_fc1), const_spec(p['b_fc1']),
        const_spec(w_fc2), const_spec(p['b_fc2']),
        const_spec(p['gamma1']),
    ]
    out_spec = pl.BlockSpec((1, N, C), lambda b: (b, 0, 0))

    return pl.pallas_call(
        kernel,
        grid=(B,),
        in_specs=in_specs,
        out_specs=out_spec,
        out_shape=jax.ShapeDtypeStruct((B, N, C), x.dtype),
        scratch_shapes=[pltpu.VMEM((N, C), jnp.float32)],   # attention-output slab
        compiler_params=pltpu.CompilerParams(
            dimension_semantics=("parallel",),
            # ~48 MiB is safe on every generation (v7x physical VMEM is 64 MiB); at real
            # dims re-size per generation (v7x <= ~56 MiB, v5e/v6e up to ~100 MiB) when
            # sweeping larger query / MLP tiles.
            vmem_limit_bytes=48 * 1024 * 1024),
    )(x, p['ln1_g'], p['ln1_b'], w_qkv,
      w_pl_t, b_pl, w_pw_t, b_pw,
      w_proj, p['b_proj'], p['ln2_g'], p['ln2_b'],
      w_fc1, p['b_fc1'], w_fc2, p['b_fc2'],
      p['gamma1'])


def reference_forward(x, p, num_heads=NUM_HEADS):
    """Pure-JAX f32 reference mirroring the PyTorch forward (dropout = identity)."""
    def ln(v, g, b):
        mu = v.mean(-1, keepdims=True)
        var = ((v - mu) ** 2).mean(-1, keepdims=True)
        return (v - mu) / jnp.sqrt(var + LN_EPS) * g + b

    B, N, C = x.shape
    H = num_heads
    D = C // H
    xn = ln(x, p['ln1_g'][0], p['ln1_b'][0])
    qkv = (xn @ p['w_qkv']).reshape(B, N, 3, H, D).transpose(2, 0, 3, 1, 4)
    q, k, v = qkv[0] * D ** -0.5, qkv[1], qkv[2]
    attn = q @ k.transpose(0, 1, 3, 2)                                   # (B,H,N,N)
    attn = jnp.einsum('bhij,hg->bgij', attn, p['w_pl']) + p['b_pl'][None, :, None, None]
    attn = jax.nn.softmax(attn, axis=-1)
    attn = jnp.einsum('bhij,hg->bgij', attn, p['w_pw']) + p['b_pw'][None, :, None, None]
    out = (attn @ v).transpose(0, 2, 1, 3).reshape(B, N, C)
    out = out @ p['w_proj'] + p['b_proj'][0]
    x1 = x + out
    xn2 = ln(x1, p['ln2_g'][0], p['ln2_b'][0])
    h = jax.nn.gelu(xn2 @ p['w_fc1'] + p['b_fc1'][0], approximate=True)
    mlp = h @ p['w_fc2'] + p['b_fc2'][0]
    return x1 + p['gamma1'][0] * mlp


def make_params(key, dim, num_heads, mlp_ratio=4.0, init_values=1e-4):
    hidden = int(dim * mlp_ratio)
    ks = jax.random.split(key, 12)
    f32 = jnp.float32
    p = {
        'ln1_g': 1.0 + 0.1 * jax.random.normal(ks[0], (1, dim), f32),
        'ln1_b': 0.1 * jax.random.normal(ks[1], (1, dim), f32),
        'w_qkv': 0.05 * jax.random.normal(ks[2], (dim, 3 * dim), f32),
        'w_pl': 0.3 * jax.random.normal(ks[3], (num_heads, num_heads), f32),
        'b_pl': 0.05 * jax.random.normal(ks[4], (num_heads,), f32),
        'w_pw': 0.3 * jax.random.normal(ks[5], (num_heads, num_heads), f32),
        'b_pw': 0.05 * jax.random.normal(ks[6], (num_heads,), f32),
        'w_proj': 0.05 * jax.random.normal(ks[7], (dim, dim), f32),
        'b_proj': 0.05 * jax.random.normal(ks[8], (1, dim), f32),
        'ln2_g': 1.0 + 0.1 * jax.random.normal(ks[9], (1, dim), f32),
        'ln2_b': 0.1 * jax.random.normal(ks[10], (1, dim), f32),
        'w_fc1': 0.05 * jax.random.normal(ks[11], (dim, hidden), f32),
        'b_fc1': jnp.zeros((1, hidden), f32),
        'w_fc2': 0.05 * jax.random.normal(jax.random.fold_in(key, 99), (hidden, dim), f32),
        'b_fc2': jnp.zeros((1, dim), f32),
        'gamma1': init_values * jnp.ones((1, dim), f32),   # nn.Parameter(init_values*ones(dim))
    }
    return p


if __name__ == "__main__":
    B, N, C = 2, 8, 32          # batch, tokens, embedding dim (toy shapes)
    key = jax.random.PRNGKey(0)
    kx, kp = jax.random.split(key)
    x = jax.random.normal(kx, (B, N, C), jnp.float32)
    params = make_params(kp, C, NUM_HEADS)

    out = layer_scale_block(x, params)
    out = jax.block_until_ready(out)

    ref = reference_forward(x, params)
    # Kernel uses bf16 matmul operands with f32 accumulation (scale folded into w_qkv);
    # the reference is pure f32, so allow mixed-precision slack.
    np.testing.assert_allclose(np.asarray(out), np.asarray(ref), rtol=2e-2, atol=2e-2)

    print("KERNEL_OK")
</pallas_src>

<mosaic_0001>
module attributes {stable_mosaic.version = 11 : i64} {
  func.func @layer_scale_block_kernel(%arg0: i32, %arg1: memref<1x8x32xf32, #tpu.memory_space<vmem>>, %arg2: memref<1x32xf32, #tpu.memory_space<vmem>>, %arg3: memref<1x32xf32, #tpu.memory_space<vmem>>, %arg4: memref<32x96xbf16, #tpu.memory_space<vmem>>, %arg5: memref<4x4xf32, #tpu.memory_space<vmem>>, %arg6: memref<4x1xf32, #tpu.memory_space<vmem>>, %arg7: memref<4x4xf32, #tpu.memory_space<vmem>>, %arg8: memref<4x1xf32, #tpu.memory_space<vmem>>, %arg9: memref<32x32xbf16, #tpu.memory_space<vmem>>, %arg10: memref<1x32xf32, #tpu.memory_space<vmem>>, %arg11: memref<1x32xf32, #tpu.memory_space<vmem>>, %arg12: memref<1x32xf32, #tpu.memory_space<vmem>>, %arg13: memref<32x128xbf16, #tpu.memory_space<vmem>>, %arg14: memref<1x128xf32, #tpu.memory_space<vmem>>, %arg15: memref<128x32xbf16, #tpu.memory_space<vmem>>, %arg16: memref<1x32xf32, #tpu.memory_space<vmem>>, %arg17: memref<1x32xf32, #tpu.memory_space<vmem>>, %arg18: memref<1x8x32xf32, #tpu.memory_space<vmem>>, %arg19: memref<8x32xf32, #tpu.memory_space<vmem>>) attributes {dimension_semantics = [#tpu.dimension_semantics<parallel>], iteration_bounds = array<i64: 2>, scalar_prefetch = 0 : i64, scratch_operands = 1 : i64, tpu.core_type = #tpu.core_type<tc>, window_params = [{transform_indices = @transform_0, window_bounds = array<i64: 1, 8, 32>}, {pipeline_mode = #tpu.pipeline_mode<synchronous>, transform_indices = @transform_1, window_bounds = array<i64: 1, 32>}, {pipeline_mode = #tpu.pipeline_mode<synchronous>, transform_indices = @transform_2, window_bounds = array<i64: 1, 32>}, {pipeline_mode = #tpu.pipeline_mode<synchronous>, transform_indices = @transform_3, window_bounds = array<i64: 32, 96>}, {pipeline_mode = #tpu.pipeline_mode<synchronous>, transform_indices = @transform_4, window_bounds = array<i64: 4, 4>}, {pipeline_mode = #tpu.pipeline_mode<synchronous>, transform_indices = @transform_5, window_bounds = array<i64: 4, 1>}, {pipeline_mode = #tpu.pipeline_mode<synchronous>, transform_indices = @transform_6, window_bounds = array<i64: 4, 4>}, {pipeline_mode = #tpu.pipeline_mode<synchronous>, transform_indices = @transform_7, window_bounds = array<i64: 4, 1>}, {pipeline_mode = #tpu.pipeline_mode<synchronous>, transform_indices = @transform_8, window_bounds = array<i64: 32, 32>}, {pipeline_mode = #tpu.pipeline_mode<synchronous>, transform_indices = @transform_9, window_bounds = array<i64: 1, 32>}, {pipeline_mode = #tpu.pipeline_mode<synchronous>, transform_indices = @transform_10, window_bounds = array<i64: 1, 32>}, {pipeline_mode = #tpu.pipeline_mode<synchronous>, transform_indices = @transform_11, window_bounds = array<i64: 1, 32>}, {pipeline_mode = #tpu.pipeline_mode<synchronous>, transform_indices = @transform_12, window_bounds = array<i64: 32, 128>}, {pipeline_mode = #tpu.pipeline_mode<synchronous>, transform_indices = @transform_13, window_bounds = array<i64: 1, 128>}, {pipeline_mode = #tpu.pipeline_mode<synchronous>, transform_indices = @transform_14, window_bounds = array<i64: 128, 32>}, {pipeline_mode = #tpu.pipeline_mode<synchronous>, transform_indices = @transform_15, window_bounds = array<i64: 1, 32>}, {pipeline_mode = #tpu.pipeline_mode<synchronous>, transform_indices = @transform_16, window_bounds = array<i64: 1, 32>}, {transform_indices = @transform_17, window_bounds = array<i64: 1, 8, 32>}]} {
    %c0 = arith.constant 0 : index
    %c0_0 = arith.constant 0 : index
    %c0_1 = arith.constant 0 : index
    %0 = vector.load %arg1[%c0, %c0_0, %c0_1] : memref<1x8x32xf32, #tpu.memory_space<vmem>>, vector<1x8x32xf32>
    %1 = vector.shape_cast %0 : vector<1x8x32xf32> to vector<8x32xf32>
    %c0_2 = arith.constant 0 : index
    %c0_3 = arith.constant 0 : index
    %2 = vector.load %arg2[%c0_2, %c0_3] : memref<1x32xf32, #tpu.memory_space<vmem>>, vector<1x32xf32>
    %c0_4 = arith.constant 0 : index
    %c0_5 = arith.constant 0 : index
    %3 = vector.load %arg3[%c0_4, %c0_5] : memref<1x32xf32, #tpu.memory_space<vmem>>, vector<1x32xf32>
    %cst = arith.constant dense<0.000000e+00> : vector<8xf32>
    %4 = vector.multi_reduction <add>, %1, %cst [1] : vector<8x32xf32> to vector<8xf32>
    %5 = vector.shape_cast %4 : vector<8xf32> to vector<8x1xf32>
    %cst_6 = arith.constant 3.200000e+01 : f32
    %6 = vector.broadcast %cst_6 : f32 to vector<8x1xf32>
    %7 = arith.divf %5, %6 : vector<8x1xf32>
    %8 = vector.broadcast %7 : vector<8x1xf32> to vector<8x32xf32>
    %9 = arith.subf %1, %8 : vector<8x32xf32>
    %10 = arith.mulf %9, %9 : vector<8x32xf32>
    %cst_7 = arith.constant dense<0.000000e+00> : vector<8xf32>
    %11 = vector.multi_reduction <add>, %10, %cst_7 [1] : vector<8x32xf32> to vector<8xf32>
    %12 = vector.shape_cast %11 : vector<8xf32> to vector<8x1xf32>
    %cst_8 = arith.constant 3.200000e+01 : f32
    %13 = vector.broadcast %cst_8 : f32 to vector<8x1xf32>
    %14 = arith.divf %12, %13 : vector<8x1xf32>
    %15 = vector.broadcast %7 : vector<8x1xf32> to vector<8x32xf32>
    %16 = arith.subf %1, %15 : vector<8x32xf32>
    %cst_9 = arith.constant 9.99999974E-6 : f32
    %17 = vector.broadcast %cst_9 : f32 to vector<8x1xf32>
    %18 = arith.addf %14, %17 : vector<8x1xf32>
    %19 = math.rsqrt %18 : vector<8x1xf32>
    %20 = vector.broadcast %19 : vector<8x1xf32> to vector<8x32xf32>
    %21 = arith.mulf %16, %20 : vector<8x32xf32>
    %22 = vector.broadcast %2 : vector<1x32xf32> to vector<8x32xf32>
    %23 = arith.mulf %21, %22 : vector<8x32xf32>
    %24 = vector.broadcast %3 : vector<1x32xf32> to vector<8x32xf32>
    %25 = arith.addf %23, %24 : vector<8x32xf32>
    %26 = arith.truncf %25 : vector<8x32xf32> to vector<8x32xbf16>
    %c0_10 = arith.constant 0 : index
    %c0_11 = arith.constant 0 : index
    %27 = vector.load %arg4[%c0_10, %c0_11] : memref<32x96xbf16, #tpu.memory_space<vmem>>, vector<32x96xbf16>
    %cst_12 = arith.constant dense<0.000000e+00> : vector<8x96xf32>
    %28 = tpu.matmul %26, %27, %cst_12 {dimension_numbers = #tpu.dot_dimension_numbers<[1], [0], [0], [1], [0, 0, 1, 1], [], []>} : vector<8x32xbf16>, vector<32x96xbf16>, vector<8x96xf32> -> vector<8x96xf32>
    %29 = vector.extract_strided_slice %28 {offsets = [0, 0], sizes = [8, 32], strides = [1, 1]} : vector<8x96xf32> to vector<8x32xf32>
    %30 = vector.extract_strided_slice %28 {offsets = [0, 32], sizes = [8, 32], strides = [1, 1]} : vector<8x96xf32> to vector<8x32xf32>
    %31 = vector.extract_strided_slice %28 {offsets = [0, 64], sizes = [8, 32], strides = [1, 1]} : vector<8x96xf32> to vector<8x32xf32>
    %32 = vector.shape_cast %30 : vector<8x32xf32> to vector<8x4x8xf32>
    %33 = tpu.transpose %32, [1, 0, 2] : vector<8x4x8xf32> -> vector<4x8x8xf32>
    %34 = arith.truncf %33 : vector<4x8x8xf32> to vector<4x8x8xbf16>
    %35 = vector.shape_cast %31 : vector<8x32xf32> to vector<8x4x8xf32>
    %36 = tpu.transpose %35, [1, 0, 2] : vector<8x4x8xf32> -> vector<4x8x8xf32>
    %37 = arith.truncf %36 : vector<4x8x8xf32> to vector<4x8x8xbf16>
    %c0_13 = arith.constant 0 : index
    %c0_14 = arith.constant 0 : index
    %38 = vector.load %arg5[%c0_13, %c0_14] : memref<4x4xf32, #tpu.memory_space<vmem>>, vector<4x4xf32>
    %c0_15 = arith.constant 0 : index
    %c0_16 = arith.constant 0 : index
    %39 = vector.load %arg6[%c0_15, %c0_16] : memref<4x1xf32, #tpu.memory_space<vmem>>, vector<4x1xf32>
    %c0_17 = arith.constant 0 : index
    %c0_18 = arith.constant 0 : index
    %40 = vector.load %arg7[%c0_17, %c0_18] : memref<4x4xf32, #tpu.memory_space<vmem>>, vector<4x4xf32>
    %c0_19 = arith.constant 0 : index
    %c0_20 = arith.constant 0 : index
    %41 = vector.load %arg8[%c0_19, %c0_20] : memref<4x1xf32, #tpu.memory_space<vmem>>, vector<4x1xf32>
    %42 = vector.shape_cast %29 : vector<8x32xf32> to vector<8x4x8xf32>
    %43 = tpu.transpose %42, [1, 0, 2] : vector<8x4x8xf32> -> vector<4x8x8xf32>
    %44 = arith.truncf %43 : vector<4x8x8xf32> to vector<4x8x8xbf16>
    "tpu.trace_start"() <{level = 10 : i32, message = "hqd,hkd->hqk"}> : () -> ()
    %cst_21 = arith.constant dense<0.000000e+00> : vector<4x8x8xf32>
    %45 = tpu.matmul %44, %34, %cst_21 {dimension_numbers = #tpu.dot_dimension_numbers<[2], [2], [1], [1], [0, 0, 0, 1, 1, 1], [0], [0]>} : vector<4x8x8xbf16>, vector<4x8x8xbf16>, vector<4x8x8xf32> -> vector<4x8x8xf32>
    "tpu.trace_stop"() : () -> ()
    %46 = vector.shape_cast %45 : vector<4x8x8xf32> to vector<4x64xf32>
    %cst_22 = arith.constant dense<0.000000e+00> : vector<4x64xf32>
    %47 = tpu.matmul %38, %46, %cst_22 {dimension_numbers = #tpu.dot_dimension_numbers<[1], [0], [0], [1], [0, 0, 1, 1], [], []>} : vector<4x4xf32>, vector<4x64xf32>, vector<4x64xf32> -> vector<4x64xf32>
    %48 = vector.broadcast %39 : vector<4x1xf32> to vector<4x64xf32>
    %49 = arith.addf %47, %48 : vector<4x64xf32>
    %50 = vector.shape_cast %49 : vector<4x64xf32> to vector<4x8x8xf32>
    %cst_23 = arith.constant dense<0xFF800000> : vector<4x8xf32>
    %51 = vector.multi_reduction <maximumf>, %50, %cst_23 [2] : vector<4x8x8xf32> to vector<4x8xf32>
    %52 = vector.shape_cast %51 : vector<4x8xf32> to vector<4x8x1xf32>
    %53 = vector.broadcast %52 : vector<4x8x1xf32> to vector<4x8x8xf32>
    %54 = arith.subf %50, %53 : vector<4x8x8xf32>
    %55 = math.exp %54 : vector<4x8x8xf32>
    %cst_24 = arith.constant dense<0.000000e+00> : vector<4x8xf32>
    %56 = vector.multi_reduction <add>, %55, %cst_24 [2] : vector<4x8x8xf32> to vector<4x8xf32>
    %57 = vector.shape_cast %56 : vector<4x8xf32> to vector<4x8x1xf32>
    %58 = tpu.reciprocal %57 {approx = true} : vector<4x8x1xf32> -> vector<4x8x1xf32>
    %59 = vector.broadcast %58 : vector<4x8x1xf32> to vector<4x8x8xf32>
    %60 = arith.mulf %55, %59 : vector<4x8x8xf32>
    %61 = vector.shape_cast %60 : vector<4x8x8xf32> to vector<4x64xf32>
    %cst_25 = arith.constant dense<0.000000e+00> : vector<4x64xf32>
    %62 = tpu.matmul %40, %61, %cst_25 {dimension_numbers = #tpu.dot_dimension_numbers<[1], [0], [0], [1], [0, 0, 1, 1], [], []>} : vector<4x4xf32>, vector<4x64xf32>, vector<4x64xf32> -> vector<4x64xf32>
    %63 = vector.broadcast %41 : vector<4x1xf32> to vector<4x64xf32>
    %64 = arith.addf %62, %63 : vector<4x64xf32>
    %65 = vector.shape_cast %64 : vector<4x64xf32> to vector<4x8x8xf32>
    %66 = arith.truncf %65 : vector<4x8x8xf32> to vector<4x8x8xbf16>
    "tpu.trace_start"() <{level = 10 : i32, message = "hqk,hkd->hqd"}> : () -> ()
    %cst_26 = arith.constant dense<0.000000e+00> : vector<4x8x8xf32>
    %67 = tpu.matmul %66, %37, %cst_26 {dimension_numbers = #tpu.dot_dimension_numbers<[2], [1], [1], [2], [0, 0, 0, 1, 1, 2], [0], [0]>} : vector<4x8x8xbf16>, vector<4x8x8xbf16>, vector<4x8x8xf32> -> vector<4x8x8xf32>
    "tpu.trace_stop"() : () -> ()
    %68 = tpu.transpose %67, [1, 0, 2] : vector<4x8x8xf32> -> vector<8x4x8xf32>
    %69 = vector.shape_cast %68 : vector<8x4x8xf32> to vector<8x32xf32>
    %c0_27 = arith.constant 0 : index
    %c0_28 = arith.constant 0 : index
    %70 = vector.load %arg19[%c0_27, %c0_28] : memref<8x32xf32, #tpu.memory_space<vmem>>, vector<8x32xf32>
    tpu.vector_store %arg19[%c0_27, %c0_28], %69 {strides = array<i32>} : memref<8x32xf32, #tpu.memory_space<vmem>>, vector<8x32xf32>,
    %c0_29 = arith.constant 0 : index
    %c0_30 = arith.constant 0 : index
    %71 = vector.load %arg19[%c0_29, %c0_30] : memref<8x32xf32, #tpu.memory_space<vmem>>, vector<8x32xf32>
    %72 = arith.truncf %71 : vector<8x32xf32> to vector<8x32xbf16>
    %c0_31 = arith.constant 0 : index
    %c0_32 = arith.constant 0 : index
    %73 = vector.load %arg9[%c0_31, %c0_32] : memref<32x32xbf16, #tpu.memory_space<vmem>>, vector<32x32xbf16>
    %cst_33 = arith.constant dense<0.000000e+00> : vector<8x32xf32>
    %74 = tpu.matmul %72, %73, %cst_33 {dimension_numbers = #tpu.dot_dimension_numbers<[1], [0], [0], [1], [0, 0, 1, 1], [], []>} : vector<8x32xbf16>, vector<32x32xbf16>, vector<8x32xf32> -> vector<8x32xf32>
    %c0_34 = arith.constant 0 : index
    %c0_35 = arith.constant 0 : index
    %75 = vector.load %arg10[%c0_34, %c0_35] : memref<1x32xf32, #tpu.memory_space<vmem>>, vector<1x32xf32>
    %76 = vector.broadcast %75 : vector<1x32xf32> to vector<8x32xf32>
    %77 = arith.addf %74, %76 : vector<8x32xf32>
    %78 = arith.addf %1, %77 : vector<8x32xf32>
    %c0_36 = arith.constant 0 : index
    %c0_37 = arith.constant 0 : index
    %79 = vector.load %arg11[%c0_36, %c0_37] : memref<1x32xf32, #tpu.memory_space<vmem>>, vector<1x32xf32>
    %c0_38 = arith.constant 0 : index
    %c0_39 = arith.constant 0 : index
    %80 = vector.load %arg12[%c0_38, %c0_39] : memref<1x32xf32, #tpu.memory_space<vmem>>, vector<1x32xf32>
    %cst_40 = arith.constant dense<0.000000e+00> : vector<8xf32>
    %81 = vector.multi_reduction <add>, %78, %cst_40 [1] : vector<8x32xf32> to vector<8xf32>
    %82 = vector.shape_cast %81 : vector<8xf32> to vector<8x1xf32>
    %cst_41 = arith.constant 3.200000e+01 : f32
    %83 = vector.broadcast %cst_41 : f32 to vector<8x1xf32>
    %84 = arith.divf %82, %83 : vector<8x1xf32>
    %85 = vector.broadcast %84 : vector<8x1xf32> to vector<8x32xf32>
    %86 = arith.subf %78, %85 : vector<8x32xf32>
    %87 = arith.mulf %86, %86 : vector<8x32xf32>
    %cst_42 = arith.constant dense<0.000000e+00> : vector<8xf32>
    %88 = vector.multi_reduction <add>, %87, %cst_42 [1] : vector<8x32xf32> to vector<8xf32>
    %89 = vector.shape_cast %88 : vector<8xf32> to vector<8x1xf32>
    %cst_43 = arith.constant 3.200000e+01 : f32
    %90 = vector.broadcast %cst_43 : f32 to vector<8x1xf32>
    %91 = arith.divf %89, %90 : vector<8x1xf32>
    %92 = vector.broadcast %84 : vector<8x1xf32> to vector<8x32xf32>
    %93 = arith.subf %78, %92 : vector<8x32xf32>
    %cst_44 = arith.constant 9.99999974E-6 : f32
    %94 = vector.broadcast %cst_44 : f32 to vector<8x1xf32>
    %95 = arith.addf %91, %94 : vector<8x1xf32>
    %96 = math.rsqrt %95 : vector<8x1xf32>
    %97 = vector.broadcast %96 : vector<8x1xf32> to vector<8x32xf32>
    %98 = arith.mulf %93, %97 : vector<8x32xf32>
    %99 = vector.broadcast %79 : vector<1x32xf32> to vector<8x32xf32>
    %100 = arith.mulf %98, %99 : vector<8x32xf32>
    %101 = vector.broadcast %80 : vector<1x32xf32> to vector<8x32xf32>
    %102 = arith.addf %100, %101 : vector<8x32xf32>
    %103 = arith.truncf %102 : vector<8x32xf32> to vector<8x32xbf16>
    %c0_45 = arith.constant 0 : index
    %c0_46 = arith.constant 0 : index
    %104 = vector.load %arg13[%c0_45, %c0_46] : memref<32x128xbf16, #tpu.memory_space<vmem>>, vector<32x128xbf16>
    %cst_47 = arith.constant dense<0.000000e+00> : vector<8x128xf32>
    %105 = tpu.matmul %103, %104, %cst_47 {dimension_numbers = #tpu.dot_dimension_numbers<[1], [0], [0], [1], [0, 0, 1, 1], [], []>} : vector<8x32xbf16>, vector<32x128xbf16>, vector<8x128xf32> -> vector<8x128xf32>
    %c0_48 = arith.constant 0 : index
    %c0_49 = arith.constant 0 : index
    %106 = vector.load %arg14[%c0_48, %c0_49] : memref<1x128xf32, #tpu.memory_space<vmem>>, vector<1x128xf32>
    %107 = vector.broadcast %106 : vector<1x128xf32> to vector<8x128xf32>
    %108 = arith.addf %105, %107 : vector<8x128xf32>
    %109 = arith.mulf %108, %108 : vector<8x128xf32>
    %110 = arith.mulf %108, %109 : vector<8x128xf32>
    %cst_50 = arith.constant 4.471500e-02 : f32
    %111 = vector.broadcast %cst_50 : f32 to vector<8x128xf32>
    %112 = arith.mulf %111, %110 : vector<8x128xf32>
    %113 = arith.addf %108, %112 : vector<8x128xf32>
    %cst_51 = arith.constant 0.797884583 : f32
    %114 = vector.broadcast %cst_51 : f32 to vector<8x128xf32>
    %115 = arith.mulf %114, %113 : vector<8x128xf32>
    %116 = math.tanh %115 : vector<8x128xf32>
    %cst_52 = arith.constant 1.000000e+00 : f32
    %117 = vector.broadcast %cst_52 : f32 to vector<8x128xf32>
    %118 = arith.addf %117, %116 : vector<8x128xf32>
    %cst_53 = arith.constant 5.000000e-01 : f32
    %119 = vector.broadcast %cst_53 : f32 to vector<8x128xf32>
    %120 = arith.mulf %119, %118 : vector<8x128xf32>
    %121 = arith.mulf %108, %120 : vector<8x128xf32>
    %122 = arith.truncf %121 : vector<8x128xf32> to vector<8x128xbf16>
    %c0_54 = arith.constant 0 : index
    %c0_55 = arith.constant 0 : index
    %123 = vector.load %arg15[%c0_54, %c0_55] : memref<128x32xbf16, #tpu.memory_space<vmem>>, vector<128x32xbf16>
    %cst_56 = arith.constant dense<0.000000e+00> : vector<8x32xf32>
    %124 = tpu.matmul %122, %123, %cst_56 {dimension_numbers = #tpu.dot_dimension_numbers<[1], [0], [0], [1], [0, 0, 1, 1], [], []>} : vector<8x128xbf16>, vector<128x32xbf16>, vector<8x32xf32> -> vector<8x32xf32>
    %c0_57 = arith.constant 0 : index
    %c0_58 = arith.constant 0 : index
    %125 = vector.load %arg16[%c0_57, %c0_58] : memref<1x32xf32, #tpu.memory_space<vmem>>, vector<1x32xf32>
    %126 = vector.broadcast %125 : vector<1x32xf32> to vector<8x32xf32>
    %127 = arith.addf %124, %126 : vector<8x32xf32>
    %c0_59 = arith.constant 0 : index
    %c0_60 = arith.constant 0 : index
    %128 = vector.load %arg17[%c0_59, %c0_60] : memref<1x32xf32, #tpu.memory_space<vmem>>, vector<1x32xf32>
    %129 = vector.broadcast %128 : vector<1x32xf32> to vector<8x32xf32>
    %130 = arith.mulf %129, %127 : vector<8x32xf32>
    %131 = arith.addf %78, %130 : vector<8x32xf32>
    %c0_61 = arith.constant 0 : index
    %c0_62 = arith.constant 0 : index
    %c0_63 = arith.constant 0 : index
    %132 = vector.load %arg18[%c0_61, %c0_62, %c0_63] : memref<1x8x32xf32, #tpu.memory_space<vmem>>, vector<1x8x32xf32>
    %133 = vector.shape_cast %132 : vector<1x8x32xf32> to vector<8x32xf32>
    %134 = vector.shape_cast %131 : vector<8x32xf32> to vector<1x8x32xf32>
    tpu.vector_store %arg18[%c0_61, %c0_62, %c0_63], %134 {strides = array<i32>} : memref<1x8x32xf32, #tpu.memory_space<vmem>>, vector<1x8x32xf32>,
    return
  }
  func.func @transform_0(%arg0: i32) -> (i32, i32, i32) {
    %c0_i32 = arith.constant 0 : i32
    %c0_i32_0 = arith.constant 0 : i32
    %c0_i32_1 = arith.constant 0 : i32
    return %arg0, %c0_i32, %c0_i32_0 : i32, i32, i32
  }
  func.func @transform_1(%arg0: i32) -> (i32, i32) {
    %c0_i32 = arith.constant 0 : i32
    %c0_i32_0 = arith.constant 0 : i32
    %c0_i32_1 = arith.constant 0 : i32
    return %c0_i32, %c0_i32_0 : i32, i32
  }
  func.func @transform_2(%arg0: i32) -> (i32, i32) {
    %c0_i32 = arith.constant 0 : i32
    %c0_i32_0 = arith.constant 0 : i32
    %c0_i32_1 = arith.constant 0 : i32
    return %c0_i32, %c0_i32_0 : i32, i32
  }
  func.func @transform_3(%arg0: i32) -> (i32, i32) {
    %c0_i32 = arith.constant 0 : i32
    %c0_i32_0 = arith.constant 0 : i32
    %c0_i32_1 = arith.constant 0 : i32
    return %c0_i32, %c0_i32_0 : i32, i32
  }
  func.func @transform_4(%arg0: i32) -> (i32, i32) {
    %c0_i32 = arith.constant 0 : i32
    %c0_i32_0 = arith.constant 0 : i32
    %c0_i32_1 = arith.constant 0 : i32
    return %c0_i32, %c0_i32_0 : i32, i32
  }
  func.func @transform_5(%arg0: i32) -> (i32, i32) {
    %c0_i32 = arith.constant 0 : i32
    %c0_i32_0 = arith.constant 0 : i32
    %c0_i32_1 = arith.constant 0 : i32
    return %c0_i32, %c0_i32_0 : i32, i32
  }
  func.func @transform_6(%arg0: i32) -> (i32, i32) {
    %c0_i32 = arith.constant 0 : i32
    %c0_i32_0 = arith.constant 0 : i32
    %c0_i32_1 = arith.constant 0 : i32
    return %c0_i32, %c0_i32_0 : i32, i32
  }
  func.func @transform_7(%arg0: i32) -> (i32, i32) {
    %c0_i32 = arith.constant 0 : i32
    %c0_i32_0 = arith.constant 0 : i32
    %c0_i32_1 = arith.constant 0 : i32
    return %c0_i32, %c0_i32_0 : i32, i32
  }
  func.func @transform_8(%arg0: i32) -> (i32, i32) {
    %c0_i32 = arith.constant 0 : i32
    %c0_i32_0 = arith.constant 0 : i32
    %c0_i32_1 = arith.constant 0 : i32
    return %c0_i32, %c0_i32_0 : i32, i32
  }
  func.func @transform_9(%arg0: i32) -> (i32, i32) {
    %c0_i32 = arith.constant 0 : i32
    %c0_i32_0 = arith.constant 0 : i32
    %c0_i32_1 = arith.constant 0 : i32
    return %c0_i32, %c0_i32_0 : i32, i32
  }
  func.func @transform_10(%arg0: i32) -> (i32, i32) {
    %c0_i32 = arith.constant 0 : i32
    %c0_i32_0 = arith.constant 0 : i32
    %c0_i32_1 = arith.constant 0 : i32
    return %c0_i32, %c0_i32_0 : i32, i32
  }
  func.func @transform_11(%arg0: i32) -> (i32, i32) {
    %c0_i32 = arith.constant 0 : i32
    %c0_i32_0 = arith.constant 0 : i32
    %c0_i32_1 = arith.constant 0 : i32
    return %c0_i32, %c0_i32_0 : i32, i32
  }
  func.func @transform_12(%arg0: i32) -> (i32, i32) {
    %c0_i32 = arith.constant 0 : i32
    %c0_i32_0 = arith.constant 0 : i32
    %c0_i32_1 = arith.constant 0 : i32
    return %c0_i32, %c0_i32_0 : i32, i32
  }
  func.func @transform_13(%arg0: i32) -> (i32, i32) {
    %c0_i32 = arith.constant 0 : i32
    %c0_i32_0 = arith.constant 0 : i32
    %c0_i32_1 = arith.constant 0 : i32
    return %c0_i32, %c0_i32_0 : i32, i32
  }
  func.func @transform_14(%arg0: i32) -> (i32, i32) {
    %c0_i32 = arith.constant 0 : i32
    %c0_i32_0 = arith.constant 0 : i32
    %c0_i32_1 = arith.constant 0 : i32
    return %c0_i32, %c0_i32_0 : i32, i32
  }
  func.func @transform_15(%arg0: i32) -> (i32, i32) {
    %c0_i32 = arith.constant 0 : i32
    %c0_i32_0 = arith.constant 0 : i32
    %c0_i32_1 = arith.constant 0 : i32
    return %c0_i32, %c0_i32_0 : i32, i32
  }
  func.func @transform_16(%arg0: i32) -> (i32, i32) {
    %c0_i32 = arith.constant 0 : i32
    %c0_i32_0 = arith.constant 0 : i32
    %c0_i32_1 = arith.constant 0 : i32
    return %c0_i32, %c0_i32_0 : i32, i32
  }
  func.func @transform_17(%arg0: i32) -> (i32, i32, i32) {
    %c0_i32 = arith.constant 0 : i32
    %c0_i32_0 = arith.constant 0 : i32
    %c0_i32_1 = arith.constant 0 : i32
    return %arg0, %c0_i32, %c0_i32_0 : i32, i32, i32
  }
}

</mosaic_0001>

<bundles_post_ra>
// kernel: tpu_custom_call.1
= control target key start
LH: loop header
LB: loop body
LE: loop exit
PB: predicated region body
PF: predicated region fallthrough
CT: control target
= control target key end

     0   :  { %s3513_s0 = inlined_call_operand.vmem [shape: f32[2,8,32], index: 0, kind: input, shape index: {}]   ;;  %s3514_s1 = inlined_call_operand.vmem [shape: f32[1,32], index: 1, kind: input, shape index: {}]   ;;  %s3515_s2 = inlined_call_operand.vmem [shape: f32[1,32], index: 2, kind: input, shape index: {}]   ;;  %s3516_s3 = inlined_call_operand.vmem [shape: bf16[32,96], index: 3, kind: input, shape index: {}]   ;;  %s3517_s4 = inlined_call_operand.vmem [shape: f32[4,4], index: 4, kind: input, shape index: {}]   ;;  %s3518_s5 = inlined_call_operand.vmem [shape: f32[4,1], index: 5, kind: input, shape index: {}]   ;;  %s3519_s6 = inlined_call_operand.vmem [shape: f32[4,4], index: 6, kind: input, shape index: {}]   ;;  %s3520_s7 = inlined_call_operand.vmem [shape: f32[4,1], index: 7, kind: input, shape index: {}]   ;;  %s3521_s8 = inlined_call_operand.vmem [shape: bf16[32,32], index: 8, kind: input, shape index: {}]   ;;  %s3522_s9 = inlined_call_operand.vmem [shape: f32[1,32], index: 9, kind: input, shape index: {}]   ;;  %s3523_s10 = inlined_call_operand.vmem [shape: f32[1,32], index: 10, kind: input, shape index: {}]   ;;  %s3524_s11 = inlined_call_operand.vmem [shape: f32[1,32], index: 11, kind: input, shape index: {}]   ;;  %s3525_s12 = inlined_call_operand.vmem [shape: bf16[32,128], index: 12, kind: input, shape index: {}]   ;;  %s3526_s13 = inlined_call_operand.vmem [shape: f32[1,128], index: 13, kind: input, shape index: {}]   ;;  %s3527_s14 = inlined_call_operand.vmem [shape: bf16[128,32], index: 14, kind: input, shape index: {}]   ;;  %s3528_s15 = inlined_call_operand.vmem [shape: f32[1,32], index: 15, kind: input, shape index: {}]   ;;  %s3529_s16 = inlined_call_operand.vmem [shape: f32[1,32], index: 16, kind: input, shape index: {}]   ;;  %s3530_s17 = inlined_call_operand.hbm [shape: f32[2,8,32], index: 17, kind: output, shape index: {}]  }
   0x1   :  { %3557 = sst [smem:[#allocation11_spill]] %s3513_s0 }
   0x2   :  { %3558 = sst [smem:[#allocation12_spill]] %s3514_s1 }
   0x3   :  { %3559 = sst [smem:[#allocation13_spill]] %s3515_s2 }
   0x4   :  { %3560 = sst [smem:[#allocation14_spill]] %s3516_s3 }
   0x5   :  { %3561 = sst [smem:[#allocation15_spill]] %s3517_s4 }
   0x6   :  { %3562 = sst [smem:[#allocation16_spill]] %s3518_s5 }
   0x7   :  { %22 = vsyncpa [#allocation4], 0 }
   0x8   :  { %24 = vsyncpa [#allocation4 + $0x1], 0  ;;  %s3054_s24 = smov 0   ;;  %s3056_s25 = smov 0  }
   0x9   :  { %s3058_s26 = smov 0   ;;  %s3060_s27 = smov 0  }
   0xa LB: > { %3563 = sst [smem:[#allocation6_spill]] %s2929_s24  ;;  %s3075_s28 = sadd.s32 4294967295, %s2941_s27   ;;  %s2941_s27 = sphi %s3060_s27, %s3592_s27   ;;  %s2937_s26 = sphi %s3058_s26, %s3594_s26   ;;  %s2933_s25 = sphi %s3056_s25, %s3596_s25   ;;  %s2929_s24 = sphi %s3054_s24, %s3595_s24  }
   0xb   : > { %3564 = sst [smem:[#allocation7_spill]] %s2937_s26  ;;  %s2588_s29 = sadd.s32 4294967294, %s2941_s27  }
   0xc   : > { %s3079_s0 = sadd.s32 1, %s2941_s27   ;;  %s399_s30 = sadd.s32 1, %s2937_s26 }
   0xd   : > { %3565 = sst [smem:[#allocation8_spill]] %s3079_s0  ;;  %s396_s18 = ssub.s32 %s2941_s27, %s3079_s0 }
   0xe   : > { %p409_p0 = scmp.ne.s32.totalorder %s2937_s26, %s2933_s25  ;;  %p397_p1 = scmp.eq.s32.totalorder %s396_s18, 0 }
   0xf   : > { %p410_p2 = scmp.eq.s32.totalorder %s3075_s28, 1  ;;  %p415_p3 = scmp.ne.s32.totalorder %s2933_s25, %s2929_s24 }
  0x10   : > { %p416_p4 = scmp.eq.s32.totalorder %s2588_s29, 1  ;;  %p2591_p7 = scmp.ge.s32.totalorder %s2941_s27, 1 }
  0x11   : > { %s3090_s19 = scalar_select %p397_p1, %s2937_s26, %s399_s30  }
  0x12   : > { %p3092_p5 = por %p410_p2, %p409_p0  ;;  %p3096_p6 = por %p416_p4, %p415_p3 }
  0x13   : > { %3566 = sst [smem:[#allocation9_spill]] %s3090_s19  ;;  %p489_p8 = scmp.lt.s32.totalorder %s2941_s27, 3 }
  0x14   : > { %s3568_s20 = scalar_select %p3096_p6, 1, 0 }
  0x15   : > { %p490_p9 = pnand %p2591_p7, %p489_p8 }
  0x16   : > { %3569 = sst [smem:[#allocation10_spill]] %s3568_s20  ;;  %p540_p10 = scmp.lt.s32.totalorder (!%p490_p9), %s3075_s28, 1 }
  0x17   : > { %493 = sbr.rel (%p490_p9) target bundleno = 3565 (0xded), region = 88  ;;  %s3570_s30 = sld [smem:[#allocation11_spill]] (!%p490_p9) }
  0x18   : > { %s3571_s3 = sld [smem:[#allocation14_spill]] (!%p490_p9)  ;;  %s3531_s23 = smov (!%p490_p9), 104  }
  0x19   : > { %s3573_s2 = sld [smem:[#allocation13_spill]] (!%p490_p9)  ;;  %s3539_s19 = smov (!%p490_p9), 120  }
  0x1a   : > { %s3541_s29 = smov (!%p490_p9), 112   ;;  %s3574_s5 = sld [smem:[#allocation16_spill]] (!%p490_p9) }
  0x1b   : > { %s3575_s4 = sld [smem:[#allocation15_spill]] (!%p490_p9)  ;;  %s3586_s20 = smov (!%p490_p9), 56  }
  0x1c   : > { %s541_s21 = scalar_select %p540_p10, %s3075_s28, 1  ;;  %vm548_vm0 = vcmask 261120   ;;  %v2943_v8 = vmov 0.0   ;;  %vm2944_vm1 = vmmov 0   ;;  %v2949_v27 = vmov 1983009808  }
  0x1d   : > { %2681 = vmatprep.subr.bf16.mxu1 %v2943_v8  ;;  %2685 = vmatprep.mubr.msk.bf16.mxu1 %vm2944_vm1, %v2943_v8  ;;  %v659_v28 = vunpack.c.l.s4 %v2949_v27  ;;  %v661_v29 = vlaneseq  ;;  %v2950_v33 = vmov 1934713408   ;;  %vm1095_vm2 = vcmask 64512   ;;  %s2962_s24 = smov 64   ;;  %s3589_s26 = smov 72  }
  0x1e   : > { %s2593_s22 = sshll.u32 %s541_s21, 3  ;;  %v2844_v7 = vld [vmem:[%s3571_s3 + $0x8] sm:$0xff]   ;;  %v2845_v9 = vld [vmem:[%s3571_s3] sm:$0xff]   ;;  %2707 = vmatprep.subr.bf16.mxu0 %v2943_v8  ;;  %2709 = vmatprep.mubr.msk.bf16.mxu0 %vm2944_vm1, %v2943_v8  ;;  %v691_v34 = vunpack.c.l.s4 %v2950_v33  ;;  %s3533_s21 = smov 16   ;;  %vm1377_vm3 = vcmask 130048   ;;  %vm1379_vm4 = vcmask 195584  }
  0x1f   : > { %s3107_s18 = scalar_lea.vmem %s3570_s30, %s2593_s22  ;;  %2682 = vmatpush3.bf16.msra.mxu1 %v2844_v7  ;;  %s3572_s30 = sld [smem:[#allocation12_spill]]  ;;  %v2595_v16 = vld [vmem:[%s3573_s2] ss:$0 sm:$0xff]  ;;  %v660_v30 = vunpack.c.0.s8 %v659_v28  ;;  %v662_v31 = vshrl.u32 %v661_v29, 7  ;;  %vm1382_vm5 = vcmask 326656   ;;  %vm1384_vm6 = vcmask 392192  }
  0x20   : > { %v545_v0 = vld [vmem:[%s3107_s18] sm:$0xff]  ;;  %2683 = vmatprep.subr.bf16.mxu1 %v2943_v8  ;;  %v692_v41 = vunpack.c.0.s8 %v691_v34  ;;  %s3537_s22 = smov 24   ;;  %vm1386_vm7 = vcmask 457728   ;;  %vm1397_vm8 = vcmask 1043456   ;;  %vm1393_vm9 = vcmask 31744   ;;  %s3549_s2 = smov 72  }
  0x21   : > { %v549_v1 = vsel %vm548_vm0, %v545_v0, 0.0  ;;  %v3161_v37 = vsub.s32 %v660_v30, %v662_v31  ;;  %s3583_s3 = smov 32  }
  0x22   : > { %550 = vadd.xlane.f32.xlu0 %v549_v1  ;;  %v3171_v47 = vsub.s32 %v692_v41, %v662_v31 }
  0x23   : > { %2684 = vmatpush3.bf16.msra.mxu1 %v2845_v9 }
  0x24   : > { %2689 = vmatprep.subr.bf16.mxu1 %v2943_v8 }
  0x25   : > { %v2594_v14 = vld [vmem:[%s3572_s30] ss:$0 sm:$0xff]  ;;  %s3535_s30 = smov 96  }
  0xab   : > { %v551_v2 = vpop.xlane.xlu0 %550 }
  0xac   : > { %v553_v3 = vmul.f32 0.03125, %v551_v2 }
  0xae   : > { %v554_v4 = vsub.f32 %v545_v0, %v553_v3 }
  0xb0   : > { %v555_v5 = vmul.f32 %v554_v4, %v554_v4 }
  0xb2   : > { %v556_v6 = vsel %vm548_vm0, %v555_v5, 0.0 }
  0xb3   : > { %557 = vadd.xlane.f32.xlu0 %v556_v6 }
 0x13c   : > { %v558_v10 = vpop.xlane.xlu0 %557 }
 0x13d   : > { %v559_v11 = vmul.f32 0.03125, %v558_v10 }
 0x13f   : > { %v560_v12 = vadd.f32 1e-05, %v559_v11 }
 0x141   : > { %2858 = vrsqrt.f32 %v560_v12 }
 0x14e   : > { %v2859_v13 = vpop.eup %2858 }
 0x14f   : > { %v562_v15 = vmul.f32 %v2859_v13, %v554_v4 }
 0x151   : > { %v569_v17 = vmul.f32 %v2594_v14, %v562_v15 }
 0x153   : > { %v576_v18 = vadd.f32 %v2595_v16, %v569_v17 }
 0x155   : > { %v577_v19 = vpack.c.bf16 %v576_v18, %v576_v18 }
 0x157   : > { %2686 = vmatmul.mubr.msk.bf16.vlgmr.msra.gmra.mxu1 %vm548_vm0, %v577_v19 }
 0x158   : > { %2691 = vmatprep.mubr.msk.bf16.mxu1 %vm2944_vm1, %v2943_v8 }
 0x217   : > { %v3135_v20 = vpop.f32.mrf.mxu1 }
 0x218   : > { %642 = vrot.lane.b32.xlu0 %v3135_v20, %s3531_s23  ;;  %638 = vrot.lane.b32.xlu1 %v3135_v20, %s3539_s19  ;;  %s3543_s23 = smov 8   ;;  %s3546_s19 = smov 48  }
 0x219   : > { %v2687_v21 = vpop.f32.mrf.mxu1 }
 0x21b   : > { %v634_v22 = vpop.f32.mrf.mxu1 }
 0x21c   : > { %640 = vrot.lane.b32.xlu1 %v3135_v20, %s3541_s29  ;;  %s3578_s29 = smov 96  }
 0x21d   : > { %v2688_v23 = vpop.f32.mrf.mxu1 }
 0x220   : > { %644 = vrot.lane.b32.xlu1 %v3135_v20, %s3535_s30 }
 0x28a   : > { %v3145_v24 = vpop.permute.xlu1 %638  ;;  %v3153_v26 = vpop.permute.xlu0 %642 }
 0x28b   : > { %646 = vrot.lane.b32.xlu1 %v3145_v24, %s3535_s30  ;;  %v971_v38 = vcombine.low %v3145_v24, %v3153_v26  ;;  %v972_v39 = vcombine.high %v3145_v24, %v3153_v26 }
 0x28d   : > { %v979_v44 = vrot.slane %v971_v38, %v3161_v37  ;;  %v986_v45 = vrot.slane %v972_v39, %v3161_v37 }
 0x28e   : > { %v3149_v25 = vpop.permute.xlu1 %640 }
 0x28f   : > { %648 = vrot.lane.b32.xlu1 %v3149_v25, %s3535_s30  ;;  %v955_v35 = vcombine.low %v3135_v20, %v3149_v25  ;;  %v956_v36 = vcombine.high %v3135_v20, %v3149_v25 }
 0x291   : > { %v963_v42 = vrot.slane %v955_v35, %v3161_v37  ;;  %v970_v43 = vrot.slane %v956_v36, %v3161_v37 }
 0x292   : > { %v645_v32 = vpop.permute.xlu1 %644 }
 0x293   : > { %650 = vrot.lane.b32.xlu1 %v3153_v26, %s3535_s30  ;;  %v987_v48 = vcombine.low %v963_v42, %v979_v44  ;;  %v988_v49 = vcombine.high %v963_v42, %v979_v44  ;;  %v1003_v50 = vcombine.low %v970_v43, %v986_v45  ;;  %v1004_v51 = vcombine.high %v970_v43, %v986_v45  ;;  %s3548_s30 = smov 32  }
 0x295   : > { %v995_v57 = vrot.slane %v987_v48, %v3171_v47  ;;  %v1002_v58 = vrot.slane %v988_v49, %v3171_v47  ;;  %v1011_v59 = vrot.slane %v1003_v50, %v3171_v47  ;;  %v1018_v60 = vrot.slane %v1004_v51, %v3171_v47 }
 0x297   : > { %v1023_v5 = vcombine.low %v995_v57, %v1002_v58  ;;  %v2603_v6 = vcombine.high %v995_v57, %v1002_v58  ;;  %v1039_v7 = vcombine.low %v1011_v59, %v1018_v60  ;;  %v2604_v9 = vcombine.high %v1011_v59, %v1018_v60 }
 0x299   : > { %v1030_v18 = vrot.slane %v1023_v5, %v3161_v37  ;;  %v1038_v19 = vrot.slane %v2603_v6, %v3161_v37  ;;  %v1046_v21 = vrot.slane %v1039_v7, %v3161_v37  ;;  %v1054_v22 = vrot.slane %v2604_v9, %v3161_v37 }
 0x29b   : > { %v1055_v34 = vcombine.low %v1030_v18, %v1038_v19  ;;  %v1071_v35 = vcombine.low %v1046_v21, %v1054_v22  ;;  %v1056_v36 = vcombine.high %v1030_v18, %v1038_v19  ;;  %v1072_v38 = vcombine.high %v1046_v21, %v1054_v22 }
 0x29d   : > { %v1063_v45 = vrot.slane %v1055_v34, %v3171_v47  ;;  %v1070_v50 = vrot.slane %v1056_v36, %v3171_v47  ;;  %v1086_v51 = vrot.slane %v1072_v38, %v3171_v47 }
 0x2fd   : > { %v647_v40 = vpop.permute.xlu1 %646 }
 0x301   : > { %v649_v46 = vpop.permute.xlu1 %648 }
 0x302   : > { %v656_v52 = vcombine.low %v645_v32, %v649_v46  ;;  %v657_v53 = vcombine.high %v645_v32, %v649_v46  ;;  %v1079_v46 = vrot.slane %v1071_v35, %v3171_v47 }
 0x304   : > { %v664_v61 = vrot.slane %v656_v52, %v3161_v37  ;;  %v671_v62 = vrot.slane %v657_v53, %v3161_v37 }
 0x305   : > { %v651_v54 = vpop.permute.xlu1 %650 }
 0x306   : > { %v672_v55 = vcombine.low %v647_v40, %v651_v54  ;;  %v673_v56 = vcombine.high %v647_v40, %v651_v54 }
 0x308   : > { %v680_v63 = vrot.slane %v672_v55, %v3161_v37  ;;  %v687_v0 = vrot.slane %v673_v56, %v3161_v37  ;;  %v1087_v55 = vcombine.low %v1063_v45, %v1079_v46  ;;  %v1090_v56 = vcombine.high %v1070_v50, %v1086_v51 }
 0x30a   : > { %v688_v1 = vcombine.low %v664_v61, %v680_v63  ;;  %v689_v2 = vcombine.high %v664_v61, %v680_v63  ;;  %v704_v3 = vcombine.low %v671_v62, %v687_v0  ;;  %v705_v4 = vcombine.high %v671_v62, %v687_v0 }
 0x30b   : > { %v1091_v58 = vpack.c.bf16 %v1087_v55, %v1087_v55  ;;  %v1094_v59 = vpack.c.bf16 %v1090_v56, %v1090_v56  ;;  %v1088_v62 = vcombine.high %v1063_v45, %v1079_v46 }
 0x30c   : > { %v696_v10 = vrot.slane %v688_v1, %v3171_v47  ;;  %v703_v11 = vrot.slane %v689_v2, %v3171_v47  ;;  %v712_v12 = vrot.slane %v704_v3, %v3171_v47  ;;  %v719_v13 = vrot.slane %v705_v4, %v3171_v47 }
 0x30d   : > { %v1092_v0 = vpack.c.bf16 %v1088_v62, %v1088_v62  ;;  %v1089_v2 = vcombine.low %v1070_v50, %v1086_v51  ;;  %v948_v62 = vld [vmem:[%s3575_s4] sm:$0xf]  ;;  %s3584_s4 = smov 40  }
 0x30e   : > { %v724_v14 = vcombine.low %v696_v10, %v703_v11  ;;  %v2599_v15 = vcombine.high %v696_v10, %v703_v11  ;;  %v740_v16 = vcombine.low %v712_v12, %v719_v13  ;;  %v2600_v17 = vcombine.high %v712_v12, %v719_v13 }
 0x30f   : > { %v1093_v3 = vpack.c.bf16 %v1089_v2, %v1089_v2 }
 0x310   : > { %v731_v23 = vrot.slane %v724_v14, %v3161_v37  ;;  %v739_v27 = vrot.slane %v2599_v15, %v3161_v37  ;;  %v747_v28 = vrot.slane %v740_v16, %v3161_v37  ;;  %v755_v29 = vrot.slane %v2600_v17, %v3161_v37 }
 0x312   : > { %v756_v30 = vcombine.low %v731_v23, %v739_v27  ;;  %v772_v31 = vcombine.low %v747_v28, %v755_v29  ;;  %v757_v32 = vcombine.high %v731_v23, %v739_v27  ;;  %v773_v33 = vcombine.high %v747_v28, %v755_v29 }
 0x314   : > { %v764_v39 = vrot.slane %v756_v30, %v3171_v47  ;;  %v780_v40 = vrot.slane %v772_v31, %v3171_v47  ;;  %v771_v41 = vrot.slane %v757_v32, %v3171_v47  ;;  %v787_v42 = vrot.slane %v773_v33, %v3171_v47 }
 0x316   : > { %v788_v43 = vcombine.low %v764_v39, %v780_v40  ;;  %v791_v44 = vcombine.high %v771_v41, %v787_v42  ;;  %v789_v54 = vcombine.high %v764_v39, %v780_v40  ;;  %v790_v61 = vcombine.low %v771_v41, %v787_v42 }
 0x318   : > { %v792_v48 = vpack.c.bf16 %v788_v43, %v788_v43  ;;  %v795_v49 = vpack.c.bf16 %v791_v44, %v791_v44  ;;  %v793_v57 = vpack.c.bf16 %v789_v54, %v789_v54  ;;  %v794_v63 = vpack.c.bf16 %v790_v61, %v790_v61 }
 0x319   : > { %v2953_v43 = vmov 0  }
 0x31a   : > { %v1100_v52 = vsel %vm1095_vm2, %v792_v48, 0  ;;  %v1238_v53 = vsel %vm1095_vm2, %v795_v49, 0  ;;  %v1146_v60 = vsel %vm1095_vm2, %v793_v57, 0  ;;  %v1192_v1 = vsel %vm1095_vm2, %v794_v63, 0  ;;  %2842 = vset.pattern.permute.xlu1 %v2953_v43  ;;  %2843 = vset.pattern.permute.xlu0 %v2953_v43  ;;  %v949_v48 = vld [vmem:[%s3574_s5] sm:$0xf] }
 0x31b   : > { %2690 = vmatpush3.bf16.xpose.msra.mxu1 %v1100_v52  ;;  %2708 = vmatpush3.bf16.xpose.msra.mxu0 %v1238_v53  ;;  %s3585_s5 = smov 48  }
 0x31c   : > { %2695 = vmatprep.subr.bf16.mxu1 %v2943_v8  ;;  %2723 = vmatprep.subr.bf16.mxu0 %v2943_v8 }
 0x322   : > { %2692 = vmatmul.mubr.msk.bf16.vlgmr.msra.gmra.mxu1 %vm1095_vm2, %v1091_v58  ;;  %2710 = vmatmul.mubr.msk.bf16.vlgmr.msra.gmra.mxu0 %vm1095_vm2, %v1094_v59 }
 0x323   : > { %2696 = vmatpush3.bf16.xpose.msra.mxu1 %v1146_v60  ;;  %2697 = vmatprep.mubr.msk.bf16.mxu1 %vm2944_vm1, %v2943_v8 }
 0x324   : > { %2701 = vmatprep.subr.bf16.mxu1 %v2943_v8  ;;  %2725 = vmatprep.mubr.msk.bf16.mxu0 %vm2944_vm1, %v2943_v8 }
 0x32a   : > { %2698 = vmatmul.mubr.msk.bf16.vlgmr.msra.gmra.mxu1 %vm1095_vm2, %v1092_v0 }
 0x32b   : > { %2702 = vmatpush3.bf16.xpose.msra.mxu1 %v1192_v1  ;;  %2703 = vmatprep.mubr.msk.bf16.mxu1 %vm2944_vm1, %v2943_v8 }
 0x32c   : > { %2713 = vmatprep.subr.mxu1 %v2943_v8 }
 0x332   : > { %2704 = vmatmul.mubr.msk.bf16.vlgmr.msra.gmra.mxu1 %vm1095_vm2, %v1093_v3 }
 0x333   : > { %2715 = vmatprep.mubr.msk.f32.mxu1 %vm2944_vm1, %v2943_v8 }
 0x3e2   : > { %v1136_v4 = vpop.f32.mrf.mxu1  ;;  %v1274_v5 = vpop.f32.mrf.mxu0 }
 0x3e4   : > { %v2693_v6 = vpop.f32.mrf.mxu1  ;;  %v2711_v7 = vpop.f32.mrf.mxu0 }
 0x3e6   : > { %v1139_v9 = vpop.f32.mrf.mxu1  ;;  %v1277_v10 = vpop.f32.mrf.mxu0 }
 0x3e8   : > { %v2694_v11 = vpop.f32.mrf.mxu1  ;;  %v2712_v12 = vpop.f32.mrf.mxu0 }
 0x3ea   : > { %v1182_v13 = vpop.f32.mrf.mxu1 }
 0x3eb   : > { %v1296_v17 = vcombine.low %v1182_v13, %v1274_v5  ;;  %v1297_v18 = vcombine.high %v1182_v13, %v1274_v5 }
 0x3ec   : > { %v2699_v14 = vpop.f32.mrf.mxu1 }
 0x3ed   : > { %v1304_v27 = vrot.slane %v1296_v17, %v3161_v37  ;;  %v1311_v28 = vrot.slane %v1297_v18, %v3161_v37 }
 0x3ee   : > { %v1185_v15 = vpop.f32.mrf.mxu1 }
 0x3f0   : > { %v2700_v16 = vpop.f32.mrf.mxu1 }
 0x3f2   : > { %v1228_v19 = vpop.f32.mrf.mxu1 }
 0x3f3   : > { %v1280_v21 = vcombine.low %v1136_v4, %v1228_v19  ;;  %v1281_v22 = vcombine.high %v1136_v4, %v1228_v19 }
 0x3f4   : > { %v2705_v23 = vpop.f32.mrf.mxu1 }
 0x3f5   : > { %v1288_v29 = vrot.slane %v1280_v21, %v3161_v37  ;;  %v1295_v30 = vrot.slane %v1281_v22, %v3161_v37 }
 0x3f6   : > { %v1231_v31 = vpop.f32.mrf.mxu1 }
 0x3f7   : > { %v1312_v32 = vcombine.low %v1288_v29, %v1304_v27  ;;  %v1313_v33 = vcombine.high %v1288_v29, %v1304_v27  ;;  %v1328_v34 = vcombine.low %v1295_v30, %v1311_v28  ;;  %v1329_v39 = vcombine.high %v1295_v30, %v1311_v28 }
 0x3f8   : > { %v2706_v35 = vpop.f32.mrf.mxu1 }
 0x3f9   : > { %v1327_v36 = vrot.slane %v1313_v33, %v3171_v47  ;;  %v1320_v38 = vrot.slane %v1312_v32, %v3171_v47  ;;  %v1336_v41 = vrot.slane %v1328_v34, %v3171_v47  ;;  %v1343_v45 = vrot.slane %v1329_v39, %v3171_v47 }
 0x3fb   : > { %1353 = vrot.lane.b32.xlu1 %v1327_v36, %s3533_s21  ;;  %v1345_v40 = vcombine.high %v1327_v36, %v2943_v8  ;;  %v1344_v42 = vcombine.high %v1320_v38, %v2943_v8  ;;  %v1346_v44 = vcombine.high %v1336_v41, %v2943_v8  ;;  %s3547_s21 = smov 40   ;;  %v1347_v46 = vcombine.high %v1343_v45, %v2943_v8 }
 0x3fd   : > { %1357 = vrot.lane.b32.xlu0 %v1345_v40, %s3537_s22  ;;  %s3545_s22 = smov 56  }
 0x3ff   : > { %1349 = vrot.lane.b32.xlu1 %v1344_v42, %s3543_s23  ;;  %s3577_s23 = smov 120  }
 0x401   : > { %1365 = vrot.lane.b32.xlu0 %v1346_v44, %s3547_s21  ;;  %s3551_s21 = smov 80  }
 0x403   : > { %1361 = vrot.lane.b32.xlu1 %v1336_v41, %s3548_s30  ;;  %s3550_s30 = smov 88  }
 0x405   : > { %1373 = vrot.lane.b32.xlu0 %v1347_v46, %s3545_s22  ;;  %s3576_s22 = smov 112  }
 0x407   : > { %1369 = vrot.lane.b32.xlu1 %v1343_v45, %s3546_s19  ;;  %s3579_s19 = smov 104  }
 0x40b   : > { %1390 = vperm.xlu1 %2842, %v949_v48  }
 0x46d   : > { %v1354_v49 = vpop.permute.xlu1 %1353 }
 0x46f   : > { %v1358_v50 = vpop.permute.xlu0 %1357 }
 0x471   : > { %v1350_v51 = vpop.permute.xlu1 %1349 }
 0x472   : > { %v1376_v52 = vsel %vm1095_vm2, %v1320_v38, %v1350_v51 }
 0x473   : > { %v1378_v53 = vsel %vm1377_vm3, %v1376_v52, %v1354_v49  ;;  %v1366_v54 = vpop.permute.xlu0 %1365 }
 0x474   : > { %v1380_v55 = vsel %vm1379_vm4, %v1378_v53, %v1358_v50 }
 0x475   : > { %v1362_v56 = vpop.permute.xlu1 %1361 }
 0x476   : > { %v1381_v57 = vsel %vm548_vm0, %v1380_v55, %v1362_v56 }
 0x477   : > { %v1383_v58 = vsel %vm1382_vm5, %v1381_v57, %v1366_v54  ;;  %v1374_v60 = vpop.permute.xlu0 %1373 }
 0x479   : > { %v1370_v59 = vpop.permute.xlu1 %1369 }
 0x47a   : > { %v1385_v61 = vsel %vm1384_vm6, %v1383_v58, %v1370_v59 }
 0x47b   : > { %v1387_v63 = vsel %vm1386_vm7, %v1385_v61, %v1374_v60 }
 0x47c   : > { %2714 = vmatpush3.msk.msra.mxu1 %vm1397_vm8, %v1387_v63 }
 0x47d   : > { %2716 = vmatmul.mubr.msk.f32.vlgmr.msra.gmra.mxu1 %vm1393_vm9, %v948_v62  ;;  %2718 = vmatprep.subr.mxu1 %v2943_v8 }
 0x47e   : > { %2720 = vmatprep.mubr.msk.f32.mxu1 %vm2944_vm1, %v2943_v8 }
 0x486   : > { %v1391_v0 = vpop.permute.xlu1 %1390 }
 0x53d   : > { %v1467_v1 = vpop.f32.mrf.mxu1 }
 0x53e   : > { %v1468_v2 = vadd.f32 %v1467_v1, %v1391_v0 }
 0x53f   : > { %v2717_v3 = vpop.f32.mrf.mxu1 }
 0x540   : > { %1475 = vrot.lane.b32.xlu1 %v1468_v2, %s3576_s22  ;;  %1472 = vrot.lane.b32.xlu0 %v1468_v2, %s3577_s23 }
 0x544   : > { %1481 = vrot.lane.b32.xlu1 %v1468_v2, %s3578_s29  ;;  %1478 = vrot.lane.b32.xlu0 %v1468_v2, %s3579_s19 }
 0x548   : > { %1487 = vrot.lane.b32.xlu1 %v1468_v2, %s3551_s21  ;;  %1484 = vrot.lane.b32.xlu0 %v1468_v2, %s3550_s30  ;;  %s3581_s30 = smov 8   ;;  %s3582_s21 = smov 24  }
 0x54c   : > { %1490 = vrot.lane.b32.xlu0 %v1468_v2, %s3549_s2  ;;  %s3580_s2 = smov 16  }
 0x5b2   : > { %v1476_v4 = vpop.permute.xlu1 %1475  ;;  %v1473_v5 = vpop.permute.xlu0 %1472 }
 0x5b3   : > { %v1493_v12 = vcombine.low %v1468_v2, %v1476_v4 }
 0x5b5   : > { %v1500_v16 = vrot.slane %v1493_v12, %v3161_v37 }
 0x5b6   : > { %v1482_v6 = vpop.permute.xlu1 %1481  ;;  %v1479_v7 = vpop.permute.xlu0 %1478 }
 0x5b7   : > { %v1501_v9 = vcombine.low %v1473_v5, %v1479_v7 }
 0x5b9   : > { %v1508_v13 = vrot.slane %v1501_v9, %v3161_v37 }
 0x5ba   : > { %v1488_v10 = vpop.permute.xlu1 %1487  ;;  %v1485_v11 = vpop.permute.xlu0 %1484 }
 0x5bb   : > { %v1509_v14 = vcombine.low %v1482_v6, %v1488_v10  ;;  %v1525_v18 = vcombine.low %v1500_v16, %v1508_v13  ;;  %v1526_v22 = vcombine.high %v1500_v16, %v1508_v13 }
 0x5bd   : > { %v1516_v19 = vrot.slane %v1509_v14, %v3161_v37  ;;  %v1533_v28 = vrot.slane %v1525_v18, %v3171_v47  ;;  %v1540_v33 = vrot.slane %v1526_v22, %v3171_v47 }
 0x5be   : > { %v1491_v15 = vpop.permute.xlu0 %1490 }
 0x5bf   : > { %v1517_v17 = vcombine.low %v1485_v11, %v1491_v15 }
 0x5c1   : > { %v1524_v21 = vrot.slane %v1517_v17, %v3161_v37 }
 0x5c3   : > { %v1541_v23 = vcombine.low %v1516_v19, %v1524_v21  ;;  %v1542_v27 = vcombine.high %v1516_v19, %v1524_v21 }
 0x5c5   : > { %v1549_v29 = vrot.slane %v1541_v23, %v3171_v47  ;;  %v1556_v30 = vrot.slane %v1542_v27, %v3171_v47 }
 0x5c7   : > { %v1558_v31 = vcombine.high %v1533_v28, %v1549_v29  ;;  %v1557_v32 = vcombine.low %v1533_v28, %v1549_v29  ;;  %v1559_v36 = vcombine.low %v1540_v33, %v1556_v30  ;;  %v1560_v38 = vcombine.high %v1540_v33, %v1556_v30 }
 0x5c9   : > { %v1564_v34 = vsel %vm1095_vm2, %v1558_v31, -inf  ;;  %v1561_v35 = vsel %vm1095_vm2, %v1557_v32, -inf  ;;  %v1567_v39 = vsel %vm1095_vm2, %v1559_v36, -inf  ;;  %v1570_v40 = vsel %vm1095_vm2, %v1560_v38, -inf }
 0x5ca   : > { %1565 = vmax.xlane.f32.xlu0 %v1564_v34  ;;  %1562 = vmax.xlane.f32.xlu1 %v1561_v35  ;;  %v951_v35 = vld [vmem:[%s3520_s7] sm:$0xf] }
 0x5ce   : > { %1568 = vmax.xlane.f32.xlu0 %v1567_v39  ;;  %1571 = vmax.xlane.f32.xlu1 %v1570_v40 }
 0x653   : > { %v1566_v41 = vpop.xlane.xlu0 %1565  ;;  %v1563_v42 = vpop.xlane.xlu1 %1562 }
 0x654   : > { %v1574_v43 = vsub.f32 %v1558_v31, %v1566_v41  ;;  %v1573_v44 = vsub.f32 %v1557_v32, %v1563_v42 }
 0x656   : > { %v1579_v45 = vmul.f32 1.442695, %v1574_v43  ;;  %v1577_v46 = vmul.f32 1.442695, %v1573_v44 }
 0x657   : > { %v1569_v48 = vpop.xlane.xlu0 %1568  ;;  %v1572_v49 = vpop.xlane.xlu1 %1571 }
 0x658   : > { %2860 = vpow2.f32 %v1579_v45  ;;  %v1575_v50 = vsub.f32 %v1559_v36, %v1569_v48  ;;  %v1576_v51 = vsub.f32 %v1560_v38, %v1572_v49 }
 0x659   : > { %2862 = vpow2.f32 %v1577_v46 }
 0x65a   : > { %v1581_v52 = vmul.f32 1.442695, %v1575_v50  ;;  %v1583_v53 = vmul.f32 1.442695, %v1576_v51 }
 0x65c   : > { %2864 = vpow2.f32 %v1581_v52 }
 0x65d   : > { %2866 = vpow2.f32 %v1583_v53 }
 0x665   : > { %v2861_v54 = vpop.eup %2860 }
 0x666   : > { %v2863_v55 = vpop.eup %2862  ;;  %v1588_v56 = vsel %vm1095_vm2, %v2861_v54, 0.0 }
 0x667   : > { %1589 = vadd.xlane.f32.xlu1 %v1588_v56  ;;  %v1585_v57 = vsel %vm1095_vm2, %v2863_v55, 0.0 }
 0x668   : > { %1586 = vadd.xlane.f32.xlu0 %v1585_v57 }
 0x669   : > { %v2865_v58 = vpop.eup %2864 }
 0x66a   : > { %v2867_v59 = vpop.eup %2866  ;;  %v1591_v60 = vsel %vm1095_vm2, %v2865_v58, 0.0 }
 0x66b   : > { %v1594_v61 = vsel %vm1095_vm2, %v2867_v59, 0.0 }
 0x66c   : > { %1592 = vadd.xlane.f32.xlu0 %v1591_v60  ;;  %1595 = vadd.xlane.f32.xlu1 %v1594_v61 }
 0x6f0   : > { %v1590_v62 = vpop.xlane.xlu1 %1589 }
 0x6f1   : > { %v1587_v63 = vpop.xlane.xlu0 %1586 }
 0x6f2   : > { %2868 = vrcp.f32 %v1587_v63 }
 0x6f3   : > { %2870 = vrcp.f32 %v1590_v62 }
 0x6f5   : > { %v1593_v0 = vpop.xlane.xlu0 %1592  ;;  %v1596_v1 = vpop.xlane.xlu1 %1595 }
 0x6f6   : > { %2872 = vrcp.f32 %v1593_v0 }
 0x6f7   : > { %2874 = vrcp.f32 %v1596_v1 }
 0x6ff   : > { %v2869_v2 = vpop.eup %2868 }
 0x700   : > { %v2871_v3 = vpop.eup %2870  ;;  %v1601_v6 = vmul.f32 %v2869_v2, %v2863_v55 }
 0x701   : > { %v1602_v9 = vmul.f32 %v2871_v3, %v2861_v54 }
 0x703   : > { %v2873_v4 = vpop.eup %2872 }
 0x704   : > { %v2875_v5 = vpop.eup %2874  ;;  %v1603_v7 = vmul.f32 %v2873_v4, %v2865_v58 }
 0x705   : > { %v1604_v10 = vmul.f32 %v2875_v5, %v2867_v59 }
 0x706   : > { %v1605_v11 = vcombine.low %v1601_v6, %v1603_v7  ;;  %v1606_v12 = vcombine.high %v1601_v6, %v1603_v7 }
 0x707   : > { %v1621_v13 = vcombine.low %v1602_v9, %v1604_v10  ;;  %v1622_v14 = vcombine.high %v1602_v9, %v1604_v10 }
 0x708   : > { %v1613_v15 = vrot.slane %v1605_v11, %v3161_v37  ;;  %v1620_v17 = vrot.slane %v1606_v12, %v3161_v37 }
 0x709   : > { %v1629_v16 = vrot.slane %v1621_v13, %v3161_v37  ;;  %v1636_v18 = vrot.slane %v1622_v14, %v3161_v37 }
 0x70b   : > { %v1638_v19 = vcombine.high %v1613_v15, %v1629_v16  ;;  %v1637_v21 = vcombine.low %v1613_v15, %v1629_v16  ;;  %v1653_v27 = vcombine.low %v1620_v17, %v1636_v18  ;;  %v1654_v31 = vcombine.high %v1620_v17, %v1636_v18 }
 0x70d   : > { %v1652_v22 = vrot.slane %v1638_v19, %v3171_v47  ;;  %v1645_v23 = vrot.slane %v1637_v21, %v3171_v47  ;;  %v1661_v30 = vrot.slane %v1653_v27, %v3171_v47  ;;  %v1668_v33 = vrot.slane %v1654_v31, %v3171_v47 }
 0x70f   : > { %1678 = vrot.lane.b32.xlu1 %v1652_v22, %s3580_s2  ;;  %v1669_v28 = vcombine.high %v1645_v23, %v2943_v8  ;;  %v1670_v29 = vcombine.high %v1652_v22, %v2943_v8  ;;  %v1671_v32 = vcombine.high %v1661_v30, %v2943_v8  ;;  %v1672_v34 = vcombine.high %v1668_v33, %v2943_v8 }
 0x711   : > { %1674 = vrot.lane.b32.xlu0 %v1669_v28, %s3581_s30 }
 0x713   : > { %1682 = vrot.lane.b32.xlu1 %v1670_v29, %s3582_s21 }
 0x715   : > { %1686 = vrot.lane.b32.xlu0 %v1661_v30, %s3583_s3 }
 0x717   : > { %1690 = vrot.lane.b32.xlu1 %v1671_v32, %s3584_s4 }
 0x719   : > { %1694 = vrot.lane.b32.xlu0 %v1668_v33, %s3585_s5  ;;  %s3587_s5 = smov 80  }
 0x71b   : > { %1698 = vrot.lane.b32.xlu1 %v1672_v34, %s3586_s20 }
 0x71d   : > { %1710 = vperm.xlu0 %2843, %v951_v35  }
 0x71f   : > { %796 = vrot.lane.b32.xlu1 %v3135_v20, %s2962_s24 }
 0x721   : > { %800 = vrot.lane.b32.xlu0 %v3149_v25, %s2962_s24 }
 0x723   : > { %798 = vrot.lane.b32.xlu1 %v3145_v24, %s2962_s24 }
 0x727   : > { %802 = vrot.lane.b32.xlu1 %v3153_v26, %s2962_s24  ;;  %v950_v26 = vld [vmem:[%s3519_s6] sm:$0xf]  ;;  %s3588_s24 = smov 88  }
 0x781   : > { %v1679_v36 = vpop.permute.xlu1 %1678 }
 0x783   : > { %v1675_v38 = vpop.permute.xlu0 %1674 }
 0x784   : > { %v1701_v39 = vsel %vm1095_vm2, %v1645_v23, %v1675_v38 }
 0x785   : > { %v1683_v40 = vpop.permute.xlu1 %1682  ;;  %v1702_v41 = vsel %vm1377_vm3, %v1701_v39, %v1679_v36 }
 0x786   : > { %v1703_v42 = vsel %vm1379_vm4, %v1702_v41, %v1683_v40 }
 0x787   : > { %v1687_v43 = vpop.permute.xlu0 %1686 }
 0x788   : > { %v1704_v44 = vsel %vm548_vm0, %v1703_v42, %v1687_v43 }
 0x789   : > { %v1691_v45 = vpop.permute.xlu1 %1690 }
 0x78a   : > { %v1705_v20 = vsel %vm1382_vm5, %v1704_v44, %v1691_v45 }
 0x78b   : > { %v1695_v25 = vpop.permute.xlu0 %1694 }
 0x78c   : > { %v1706_v24 = vsel %vm1384_vm6, %v1705_v20, %v1695_v25 }
 0x78d   : > { %v1699_v46 = vpop.permute.xlu1 %1698 }
 0x78e   : > { %v1707_v48 = vsel %vm1386_vm7, %v1706_v24, %v1699_v46 }
 0x78f   : > { %2719 = vmatpush3.msk.msra.mxu1 %vm1397_vm8, %v1707_v48 }
 0x790   : > { %2721 = vmatmul.mubr.msk.f32.vlgmr.msra.gmra.mxu1 %vm1393_vm9, %v950_v26  ;;  %2729 = vmatprep.subr.bf16.mxu1 %v2943_v8 }
 0x791   : > { %v797_v49 = vpop.permute.xlu1 %796  ;;  %2731 = vmatprep.mubr.msk.bf16.mxu1 %vm2944_vm1, %v2943_v8 }
 0x795   : > { %v799_v50 = vpop.permute.xlu1 %798 }
 0x798   : > { %v1711_v51 = vpop.permute.xlu0 %1710 }
 0x799   : > { %v803_v52 = vpop.permute.xlu1 %802 }
 0x79a   : > { %v824_v53 = vcombine.low %v799_v50, %v803_v52  ;;  %v825_v54 = vcombine.high %v799_v50, %v803_v52 }
 0x79c   : > { %v801_v55 = vpop.permute.xlu0 %800  ;;  %v832_v58 = vrot.slane %v824_v53, %v3161_v37  ;;  %v839_v59 = vrot.slane %v825_v54, %v3161_v37 }
 0x79d   : > { %v808_v56 = vcombine.low %v797_v49, %v801_v55  ;;  %v809_v57 = vcombine.high %v797_v49, %v801_v55 }
 0x79f   : > { %v816_v60 = vrot.slane %v808_v56, %v3161_v37  ;;  %v823_v61 = vrot.slane %v809_v57, %v3161_v37 }
 0x7a1   : > { %v840_v62 = vcombine.low %v816_v60, %v832_v58  ;;  %v841_v63 = vcombine.high %v816_v60, %v832_v58  ;;  %v856_v0 = vcombine.low %v823_v61, %v839_v59  ;;  %v857_v1 = vcombine.high %v823_v61, %v839_v59 }
 0x7a3   : > { %v848_v2 = vrot.slane %v840_v62, %v3171_v47  ;;  %v855_v3 = vrot.slane %v841_v63, %v3171_v47  ;;  %v864_v4 = vrot.slane %v856_v0, %v3171_v47  ;;  %v871_v5 = vrot.slane %v857_v1, %v3171_v47 }
 0x7a5   : > { %v876_v6 = vcombine.low %v848_v2, %v855_v3  ;;  %v2601_v7 = vcombine.high %v848_v2, %v855_v3  ;;  %v892_v9 = vcombine.low %v864_v4, %v871_v5  ;;  %v2602_v10 = vcombine.high %v864_v4, %v871_v5 }
 0x7a7   : > { %v883_v11 = vrot.slane %v876_v6, %v3161_v37  ;;  %v891_v12 = vrot.slane %v2601_v7, %v3161_v37  ;;  %v899_v13 = vrot.slane %v892_v9, %v3161_v37  ;;  %v907_v14 = vrot.slane %v2602_v10, %v3161_v37 }
 0x7a9   : > { %v908_v15 = vcombine.low %v883_v11, %v891_v12  ;;  %v924_v16 = vcombine.low %v899_v13, %v907_v14  ;;  %v909_v17 = vcombine.high %v883_v11, %v891_v12  ;;  %v925_v18 = vcombine.high %v899_v13, %v907_v14 }
 0x7ab   : > { %v916_v19 = vrot.slane %v908_v15, %v3171_v47  ;;  %v932_v21 = vrot.slane %v924_v16, %v3171_v47  ;;  %v923_v22 = vrot.slane %v909_v17, %v3171_v47  ;;  %v939_v23 = vrot.slane %v925_v18, %v3171_v47 }
 0x7ad   : > { %v940_v27 = vcombine.low %v916_v19, %v932_v21  ;;  %v941_v28 = vcombine.high %v916_v19, %v932_v21  ;;  %v942_v29 = vcombine.low %v923_v22, %v939_v23  ;;  %v943_v30 = vcombine.high %v923_v22, %v939_v23 }
 0x7af   : > { %v944_v31 = vpack.c.bf16 %v940_v27, %v940_v27  ;;  %v945_v32 = vpack.c.bf16 %v941_v28, %v941_v28  ;;  %v946_v56 = vpack.c.bf16 %v942_v29, %v942_v29  ;;  %v947_v60 = vpack.c.bf16 %v943_v30, %v943_v30 }
 0x7b1   : > { %v1887_v33 = vsel %vm1397_vm8, %v944_v31, 0  ;;  %v1933_v34 = vsel %vm1397_vm8, %v945_v32, 0  ;;  %v1979_v1 = vsel %vm1397_vm8, %v946_v56, 0  ;;  %v2025_v2 = vsel %vm1397_vm8, %v947_v60, 0 }
 0x7b2   : > { %2724 = vmatpush3.bf16.msra.mxu0 %v1887_v33  ;;  %2730 = vmatpush3.bf16.msra.mxu1 %v1933_v34 }
 0x7b3   : > { %2735 = vmatprep.subr.bf16.mxu0 %v2943_v8  ;;  %2741 = vmatprep.subr.bf16.mxu1 %v2943_v8 }
 0x850   : > { %v1785_v35 = vpop.f32.mrf.mxu1 }
 0x851   : > { %v1786_v36 = vadd.f32 %v1785_v35, %v1711_v51 }
 0x852   : > { %v2722_v38 = vpop.f32.mrf.mxu1 }
 0x853   : > { %1793 = vrot.lane.b32.xlu1 %v1786_v36, %s3576_s22  ;;  %1790 = vrot.lane.b32.xlu0 %v1786_v36, %s3577_s23 }
 0x857   : > { %1799 = vrot.lane.b32.xlu1 %v1786_v36, %s3578_s29  ;;  %1796 = vrot.lane.b32.xlu0 %v1786_v36, %s3579_s19  ;;  %s537_s19 = sand.u32 1, %s2933_s25  }
 0x858   : > { %s2592_s22 = sshll.u32 %s537_s19, 3 }
 0x859   : > { %s539_s29 = scalar_lea.vmem [#allocation3], %s2592_s22 }
 0x85a   : > { %s2529_s3 = sshll.u32 %s539_s29, 4  ;;  %s2530_s3 = int_to_ptr.vmem [resolvable:$true] %s2529_s3 }
 0x85b   : > { %1805 = vrot.lane.b32.xlu1 %v1786_v36, %s3587_s5  ;;  %1802 = vrot.lane.b32.xlu0 %v1786_v36, %s3588_s24  ;;  %s2881_s0 = scalar_lea.vmem %s2530_s3, 128 }
 0x85c   : > { %p2882_p11 = scmp.ne.s32.totalorder %s2530_s3, %s2881_s0 }
 0x85e   : > { %p2883_p12 = pnand %p2882_p11, %p3092_p5 }
 0x85f   : > { %1808 = vrot.lane.b32.xlu0 %v1786_v36, %s3589_s26  ;;  %s2516_s26 = scalar_lea.sflag [#allocation4], %s537_s19 }
 0x860   : > { %p2884_p13 = pneg %p2883_p12 }
 0x8c5   : > { %v1794_v39 = vpop.permute.xlu1 %1793  ;;  %v1791_v40 = vpop.permute.xlu0 %1790 }
 0x8c6   : > { %v1811_v20 = vcombine.low %v1786_v36, %v1794_v39 }
 0x8c8   : > { %v1818_v26 = vrot.slane %v1811_v20, %v3161_v37 }
 0x8c9   : > { %v1800_v41 = vpop.permute.xlu1 %1799  ;;  %v1797_v42 = vpop.permute.xlu0 %1796 }
 0x8ca   : > { %v1819_v43 = vcombine.low %v1791_v40, %v1797_v42 }
 0x8cc   : > { %v1826_v25 = vrot.slane %v1819_v43, %v3161_v37 }
 0x8cd   : > { %v1806_v44 = vpop.permute.xlu1 %1805  ;;  %v1803_v45 = vpop.permute.xlu0 %1802 }
 0x8ce   : > { %v1827_v24 = vcombine.low %v1800_v41, %v1806_v44  ;;  %v1843_v49 = vcombine.low %v1818_v26, %v1826_v25  ;;  %v1844_v57 = vcombine.high %v1818_v26, %v1826_v25 }
 0x8d0   : > { %v1834_v50 = vrot.slane %v1827_v24, %v3161_v37  ;;  %v1851_v53 = vrot.slane %v1843_v49, %v3171_v47  ;;  %v1858_v0 = vrot.slane %v1844_v57, %v3171_v47 }
 0x8d1   : > { %v1809_v46 = vpop.permute.xlu0 %1808 }
 0x8d2   : > { %v1835_v48 = vcombine.low %v1803_v45, %v1809_v46 }
 0x8d4   : > { %v1842_v51 = vrot.slane %v1835_v48, %v3161_v37 }
 0x8d6   : > { %v1859_v52 = vcombine.low %v1834_v50, %v1842_v51  ;;  %v1860_v54 = vcombine.high %v1834_v50, %v1842_v51  ;;  %v2846_v50 = vld [vmem:[%s3521_s8 + $0x8] sm:$0xff]  }
 0x8d8   : > { %v1867_v55 = vrot.slane %v1859_v52, %v3171_v47  ;;  %v1874_v61 = vrot.slane %v1860_v54, %v3171_v47 }
 0x8da   : > { %v1875_v58 = vcombine.low %v1851_v53, %v1867_v55  ;;  %v1876_v59 = vcombine.high %v1851_v53, %v1867_v55  ;;  %v1877_v3 = vcombine.low %v1858_v0, %v1874_v61  ;;  %v1878_v4 = vcombine.high %v1858_v0, %v1874_v61  ;;  %v2847_v55 = vld [vmem:[%s3521_s8] sm:$0xff]  }
 0x8dc   : > { %v1879_v62 = vpack.c.bf16 %v1875_v58, %v1875_v58  ;;  %v1880_v63 = vpack.c.bf16 %v1876_v59, %v1876_v59  ;;  %v1881_v5 = vpack.c.bf16 %v1877_v3, %v1877_v3  ;;  %v1882_v6 = vpack.c.bf16 %v1878_v4, %v1878_v4 }
 0x8de   : > { %2726 = vmatmul.mubr.msk.bf16.vlgmr.msra.gmra.mxu0 %vm1095_vm2, %v1879_v62  ;;  %2732 = vmatmul.mubr.msk.bf16.vlgmr.msra.gmra.mxu1 %vm1095_vm2, %v1880_v63 }
 0x8df   : > { %2736 = vmatpush3.bf16.msra.mxu0 %v1979_v1  ;;  %2742 = vmatpush3.bf16.msra.mxu1 %v2025_v2 }
 0x8e0   : > { %2737 = vmatprep.mubr.msk.bf16.mxu0 %vm2944_vm1, %v2943_v8  ;;  %2743 = vmatprep.mubr.msk.bf16.mxu1 %vm2944_vm1, %v2943_v8 }
 0x8e1   : > { %2747 = vmatprep.subr.bf16.mxu0 %v2943_v8  ;;  %2755 = vmatprep.subr.bf16.mxu1 %v2943_v8 }
 0x8e6   : > { %2738 = vmatmul.mubr.msk.bf16.vlgmr.msra.gmra.mxu0 %vm1095_vm2, %v1881_v5  ;;  %2744 = vmatmul.mubr.msk.bf16.vlgmr.msra.gmra.mxu1 %vm1095_vm2, %v1882_v6  ;;  %v2619_v6 = vld [vmem:[%s3522_s9] ss:$0 sm:$0xff] }
 0x8e7   : > { %2751 = vmatprep.mubr.msk.bf16.mxu0 %vm2944_vm1, %v2943_v8  ;;  %2759 = vmatprep.mubr.msk.bf16.mxu1 %vm2944_vm1, %v2943_v8 }
 0x8e8   : > { %2748 = vmatpush3.bf16.msra.mxu0 %v2846_v50 }
 0x8e9   : > { %2749 = vmatprep.subr.bf16.mxu0 %v2943_v8 }
 0x8ec   : > { %2750 = vmatpush3.bf16.msra.mxu0 %v2847_v55 }
 0x8ed   : > { %2763 = vmatprep.subr.bf16.mxu0 %v2943_v8 }
 0x99e   : > { %v1923_v7 = vpop.f32.mrf.mxu0  ;;  %v1969_v9 = vpop.f32.mrf.mxu1 }
 0x9a0   : > { %v2727_v10 = vpop.f32.mrf.mxu0  ;;  %v2733_v11 = vpop.f32.mrf.mxu1 }
 0x9a1   : > { %v2880_v11 = vld [vmem:[%s3107_s18] sm:$0xff]  ;;  %s2640_s18 = sshll.u32 %s3075_s28, 7  ;;  %s2963_s28 = smov [#allocation3]  }
 0x9a2   : > { %v1926_v12 = vpop.f32.mrf.mxu0  ;;  %v1972_v13 = vpop.f32.mrf.mxu1  ;;  %s3477_s24 = scalar_lea.hbm %s3530_s17, %s2640_s18  ;;  %s2885_s20 = sshll.u32 %s2963_s28, 4  ;;  %s2886_s20 = int_to_ptr.vmem [resolvable:$false] %s2885_s20 }
 0x9a3   : > { %s2887_s22 = scalar_lea.vmem %s2886_s20, 256  ;;  %p2888_p0 = scmp.lt.s32.totalorder %s2530_s3, %s2886_s20 }
 0x9a4   : > { %v2728_v14 = vpop.f32.mrf.mxu0  ;;  %v2734_v15 = vpop.f32.mrf.mxu1  ;;  %p2889_p1 = scmp.lt.s32.totalorder %s2887_s22, %s2881_s0 }
 0x9a6   : > { %v2015_v16 = vpop.f32.mrf.mxu0  ;;  %v2061_v17 = vpop.f32.mrf.mxu1  ;;  %p2890_p2 = por %p2889_p1, %p2888_p0 }
 0x9a7   : > { %v2067_v18 = vcombine.low %v1923_v7, %v2015_v16  ;;  %v2068_v19 = vcombine.high %v1923_v7, %v2015_v16  ;;  %v2083_v21 = vcombine.low %v1969_v9, %v2061_v17  ;;  %v2084_v22 = vcombine.high %v1969_v9, %v2061_v17 }
 0x9a8   : > { %v2739_v23 = vpop.f32.mrf.mxu0  ;;  %v2745_v27 = vpop.f32.mrf.mxu1  ;;  %p2891_p3 = pnand %p2890_p2, %p2884_p13 }
 0x9a9   : > { %v2075_v28 = vrot.slane %v2067_v18, %v3161_v37  ;;  %v2082_v29 = vrot.slane %v2068_v19, %v3161_v37  ;;  %v2091_v30 = vrot.slane %v2083_v21, %v3161_v37  ;;  %v2098_v31 = vrot.slane %v2084_v22, %v3161_v37  ;;  %v2848_v22 = vld [vmem:[%s3525_s12 + $0x8] sm:$0xff]   ;;  %v2849_v23 = vld [vmem:[%s3525_s12] sm:$0xff]  }
 0x9aa   : > { %v2018_v32 = vpop.f32.mrf.mxu0  ;;  %v2064_v33 = vpop.f32.mrf.mxu1  ;;  %2756 = vmatpush3.bf16.msra.mxu1 %v2848_v22 }
 0x9ab   : > { %v2099_v34 = vcombine.low %v2075_v28, %v2091_v30  ;;  %v2100_v35 = vcombine.high %v2075_v28, %v2091_v30  ;;  %v2115_v36 = vcombine.low %v2082_v29, %v2098_v31  ;;  %v2116_v38 = vcombine.high %v2082_v29, %v2098_v31  ;;  %2757 = vmatprep.subr.bf16.mxu1 %v2943_v8  ;;  %v2623_v31 = vld [vmem:[%s3523_s10] ss:$0 sm:$0xff] }
 0x9ac   : > { %v2740_v39 = vpop.f32.mrf.mxu0  ;;  %v2746_v40 = vpop.f32.mrf.mxu1  ;;  %v2624_v33 = vld [vmem:[%s3524_s11] ss:$0 sm:$0xff] }
 0x9ad   : > { %v2107_v41 = vrot.slane %v2099_v34, %v3171_v47  ;;  %v2114_v42 = vrot.slane %v2100_v35, %v3171_v47  ;;  %v2123_v43 = vrot.slane %v2115_v36, %v3171_v47  ;;  %v2130_v44 = vrot.slane %v2116_v38, %v3171_v47  ;;  %v2850_v38 = vld [vmem:[%s3527_s14 + $0x38] sm:$0xff]   ;;  %v2851_v39 = vld [vmem:[%s3527_s14 + $0x30] sm:$0xff]   ;;  %v2852_v40 = vld [vmem:[%s3527_s14 + $0x28] sm:$0xff]  }
 0x9ae   : > { %2758 = vmatpush3.bf16.msra.mxu1 %v2849_v23 }
 0x9af   : > { %v2135_v45 = vcombine.low %v2107_v41, %v2114_v42  ;;  %v2617_v20 = vcombine.high %v2107_v41, %v2114_v42  ;;  %v2151_v25 = vcombine.low %v2123_v43, %v2130_v44  ;;  %v2618_v24 = vcombine.high %v2123_v43, %v2130_v44  ;;  %v2853_v41 = vld [vmem:[%s3527_s14 + $0x20] sm:$0xff]   ;;  %v2854_v42 = vld [vmem:[%s3527_s14 + $0x18] sm:$0xff]   ;;  %v2855_v43 = vld [vmem:[%s3527_s14 + $0x10] sm:$0xff]  }
 0x9b0   : > { %v2856_v44 = vld [vmem:[%s3527_s14 + $0x8] sm:$0xff]  }
 0x9b1   : > { %v2142_v46 = vrot.slane %v2135_v45, %v3161_v37  ;;  %v2150_v26 = vrot.slane %v2617_v20, %v3161_v37  ;;  %v2158_v48 = vrot.slane %v2151_v25, %v3161_v37  ;;  %v2166_v49 = vrot.slane %v2618_v24, %v3161_v37  ;;  %v2857_v45 = vld [vmem:[%s3527_s14] sm:$0xff]  }
 0x9b2   : > { %v2625_v20 = vld [vmem:[%s3526_s13] ss:$0 sm:$0xff] }
 0x9b3   : > { %v2168_v51 = vcombine.high %v2142_v46, %v2150_v26  ;;  %v2184_v52 = vcombine.high %v2158_v48, %v2166_v49  ;;  %v2167_v53 = vcombine.low %v2142_v46, %v2150_v26  ;;  %v2183_v54 = vcombine.low %v2158_v48, %v2166_v49 }
 0x9b5   : > { %v2182_v56 = vrot.slane %v2168_v51, %v3171_v47  ;;  %v2198_v57 = vrot.slane %v2184_v52, %v3171_v47  ;;  %v2175_v37 = vrot.slane %v2167_v53, %v3171_v47  ;;  %v2191_v58 = vrot.slane %v2183_v54, %v3171_v47 }
 0x9b7   : > { %v2201_v59 = vcombine.low %v2182_v56, %v2198_v57  ;;  %v2200_v60 = vcombine.high %v2175_v37, %v2191_v58  ;;  %v2199_v61 = vcombine.low %v2175_v37, %v2191_v58  ;;  %v2202_v62 = vcombine.high %v2182_v56, %v2198_v57  ;;  %v2629_v37 = vld [vmem:[%s3528_s15] ss:$0 sm:$0xff] }
 0x9b9   : > { %2208 = vrot.lane.b32.xlu0 %v2201_v59, %s3580_s2  ;;  %2204 = vrot.lane.b32.xlu1 %v2200_v60, %s3581_s30  ;;  %v2638_v59 = vld [vmem:[%s3529_s16] ss:$0 sm:$0xff] }
 0x9bd   : > { %2212 = vrot.lane.b32.xlu1 %v2202_v62, %s3582_s21 }
 0xa2b   : > { %v2205_v63 = vpop.permute.xlu1 %2204  ;;  %v2209_v0 = vpop.permute.xlu0 %2208 }
 0xa2c   : > { %v2215_v1 = vsel %vm1095_vm2, %v2199_v61, %v2205_v63 }
 0xa2d   : > { %v2216_v47 = vsel %vm1377_vm3, %v2215_v1, %v2209_v0 }
 0xa2f   : > { %v2213_v2 = vpop.permute.xlu1 %2212 }
 0xa30   : > { %v2217_v3 = vsel %vm1379_vm4, %v2216_v47, %v2213_v2 }
 0xa31   : > { %2218 = vst.msk [vmem:[#allocation2] sm:$0xff] %vm548_vm0, %v2217_v3 }
 0xa38   : > { %v2219_v4 = vld [vmem:[#allocation2] sm:$0xff] }
 0xa39   : > { %v2220_v5 = vpack.c.bf16 %v2219_v4, %v2219_v4 }
 0xa3b   : > { %2752 = vmatmul.mubr.msk.bf16.vlgmr.msra.gmra.mxu0 %vm548_vm0, %v2220_v5 }
 0xa3c   : > { %2779 = vmatprep.mubr.msk.bf16.mxu0 %vm2944_vm1, %v2943_v8  ;;  %2764 = vmatpush3.bf16.msra.mxu0 %v2850_v38 }
 0xa3d   : > { %2765 = vmatprep.subr.bf16.mxu0 %v2943_v8 }
 0xa40   : > { %2766 = vmatpush3.bf16.msra.mxu0 %v2851_v39 }
 0xa41   : > { %2767 = vmatprep.subr.bf16.mxu0 %v2943_v8 }
 0xa44   : > { %2768 = vmatpush3.bf16.msra.mxu0 %v2852_v40 }
 0xa45   : > { %2769 = vmatprep.subr.bf16.mxu0 %v2943_v8 }
 0xa48   : > { %2770 = vmatpush3.bf16.msra.mxu0 %v2853_v41 }
 0xa49   : > { %2771 = vmatprep.subr.bf16.mxu0 %v2943_v8 }
 0xa4c   : > { %2772 = vmatpush3.bf16.msra.mxu0 %v2854_v42 }
 0xa4d   : > { %2773 = vmatprep.subr.bf16.mxu0 %v2943_v8 }
 0xa50   : > { %2774 = vmatpush3.bf16.msra.mxu0 %v2855_v43 }
 0xa51   : > { %2775 = vmatprep.subr.bf16.mxu0 %v2943_v8 }
 0xa54   : > { %2776 = vmatpush3.bf16.msra.mxu0 %v2856_v44 }
 0xa55   : > { %2777 = vmatprep.subr.bf16.mxu0 %v2943_v8 }
 0xa58   : > { %2778 = vmatpush3.bf16.msra.mxu0 %v2857_v45 }
 0xafb   : > { %v2281_v7 = vpop.f32.mrf.mxu0 }
 0xafc   : > { %v2282_v9 = vadd.f32 %v2619_v6, %v2281_v7 }
 0xafd   : > { %v2753_v10 = vpop.f32.mrf.mxu0 }
 0xafe   : > { %v3411_v12 = vadd.f32 %v2880_v11, %v2282_v9 }
 0xaff   : > { %v2284_v13 = vpop.f32.mrf.mxu0 }
 0xb00   : > { %v2290_v14 = vsel %vm548_vm0, %v3411_v12, 0.0 }
 0xb01   : > { %2291 = vadd.xlane.f32.xlu0 %v2290_v14  ;;  %v2754_v15 = vpop.f32.mrf.mxu0 }
 0xb8a   : > { %v2292_v16 = vpop.xlane.xlu0 %2291 }
 0xb8b   : > { %v2293_v17 = vmul.f32 0.03125, %v2292_v16 }
 0xb8d   : > { %v2294_v18 = vsub.f32 %v3411_v12, %v2293_v17 }
 0xb8f   : > { %v2295_v19 = vmul.f32 %v2294_v18, %v2294_v18 }
 0xb91   : > { %v2296_v21 = vsel %vm548_vm0, %v2295_v19, 0.0 }
 0xb92   : > { %2297 = vadd.xlane.f32.xlu1 %v2296_v21 }
 0xc1b   : > { %v2298_v27 = vpop.xlane.xlu1 %2297 }
 0xc1c   : > { %v2299_v28 = vmul.f32 0.03125, %v2298_v27 }
 0xc1e   : > { %v2300_v29 = vadd.f32 1e-05, %v2299_v28 }
 0xc20   : > { %2876 = vrsqrt.f32 %v2300_v29 }
 0xc2d   : > { %v2877_v30 = vpop.eup %2876 }
 0xc2e   : > { %v2302_v32 = vmul.f32 %v2877_v30, %v2294_v18 }
 0xc30   : > { %v2309_v34 = vmul.f32 %v2623_v31, %v2302_v32 }
 0xc32   : > { %v2316_v35 = vadd.f32 %v2624_v33, %v2309_v34 }
 0xc34   : > { %v2317_v36 = vpack.c.bf16 %v2316_v35, %v2316_v35 }
 0xc36   : > { %2760 = vmatmul.mubr.msk.bf16.vlgmr.msra.gmra.mxu1 %vm548_vm0, %v2317_v36 }
 0xcf6   : > { %v2378_v25 = vpop.f32.mrf.mxu1 }
 0xcf7   : > { %v2379_v24 = vadd.f32 %v2625_v20, %v2378_v25 }
 0xcf8   : > { %v2761_v46 = vpop.f32.mrf.mxu1 }
 0xcf9   : > { %v2384_v26 = vmul.f32 %v2379_v24, %v2379_v24 }
 0xcfa   : > { %v2381_v48 = vpop.f32.mrf.mxu1 }
 0xcfb   : > { %v2385_v49 = vmul.f32 %v2384_v26, %v2379_v24 }
 0xcfc   : > { %v2762_v50 = vpop.f32.mrf.mxu1 }
 0xcfd   : > { %v2386_v51 = vmul.f32 0.044715, %v2385_v49 }
 0xcff   : > { %v2387_v52 = vadd.f32 %v2386_v51, %v2379_v24 }
 0xd01   : > { %v2388_v53 = vmul.f32 0.7978846, %v2387_v52 }
 0xd03   : > { %2878 = vtanh.f32 %v2388_v53 }
 0xd10   : > { %v2879_v54 = vpop.eup %2878 }
 0xd11   : > { %v2390_v8 = vadd.f32 1.0, %v2879_v54 }
 0xd13   : > { %v2391_v55 = vmul.f32 0.5, %v2390_v8 }
 0xd15   : > { %v2392_v56 = vmul.f32 %v2391_v55, %v2379_v24 }
 0xd17   : > { %v2393_v57 = vpack.c.bf16 %v2392_v56, %v2392_v56 }
 0xd19   : > { %2780 = vmatmul.mubr.bf16.vlgmr.msra.gmra.mxu0 %v2393_v57 }
 0xdd9   : > { %v2499_v58 = vpop.f32.mrf.mxu0 }
 0xdda   : > { %v2500_v60 = vadd.f32 %v2629_v37, %v2499_v58 }
 0xddb   : > { %v2781_v61 = vpop.f32.mrf.mxu0 }
 0xddc   : > { %v2512_v62 = vmul.f32 %v2638_v59, %v2500_v60 }
 0xddd   : > { %v2502_v63 = vpop.f32.mrf.mxu0 }
 0xdde   : > { %v2513_v0 = vadd.f32 %v2512_v62, %v3411_v12 }
 0xddf   : > { %v2782_v1 = vpop.f32.mrf.mxu0 }
 0xde0   : > { %2514 = vst.msk [vmem:[%s539_s29] sm:$0xff] %vm548_vm0, %v2513_v0 }
 0xde1   : > { %2894 = shalt.err (!%p2891_p3)
}
 0xde2   : > { %s2895_s2 = scalar_lea.hbm %s3477_s24, 128  ;;  %s2899_s21 = scalar_lea.hbm %s3530_s17, 256 }
 0xde3   : > { %p2896_p4 = scmp.ne.s32.totalorder %s3477_s24, %s2895_s2  ;;  %p2900_p9 = scmp.lt.s32.totalorder %s3477_s24, %s3530_s17 }
 0xde4   : > { %p2901_p10 = scmp.lt.s32.totalorder %s2899_s21, %s2895_s2 }
 0xde5   : > { %p2897_p7 = pnand %p2896_p4, %p3092_p5 }
 0xde6   : > { %p2902_p11 = por %p2901_p10, %p2900_p9 }
 0xde7   : > { %p2898_p8 = pneg %p2897_p7 }
 0xde9   : > { %p2903_p12 = pnand %p2902_p11, %p2898_p8 }
 0xdeb   : > { %2906 = shalt.err (!%p2903_p12)
}
 0xdec   : > { %2783 = dma.vmem_to_hbm [thread:$0]  (%p3092_p5), %s2530_s3, 128, %s3477_s24, %s2516_s26  }
 0xded PF: > { %s3590_s29 = sld [smem:[#allocation6_spill]]  ;;  %p2789_p13 = scmp.ge.s32.totalorder %s2941_s27, 2 }
 0xdef   : > { %p2786_p0 = pnand %p2789_p13, %p3096_p6 }
 0xdf1   : > { %p2787_p1 = pneg %p2786_p0 }
 0xdf3   : > { %s2541_s5 = sand.u32 1, %s3590_s29  }
 0xdf4   : > { %s2542_s0 = scalar_lea.sflag [#allocation4], %s2541_s5 }
 0xdf5   : > { %2924 = dma.done.wait (%p2787_p1), %s2542_s0, 128  }
 0xdf6   : > { %2926 = vsyncadd (%p2787_p1), %s2542_s0, 4294967168  ;;  %s3592_s27 = sld [smem:[#allocation8_spill]]  ;;  %s3595_s24 = smov %s2933_s25 }
 0xdf7   : > { %s3593_s28 = sld [smem:[#allocation7_spill]] }
 0xdf8   : > { %s3594_s26 = sld [smem:[#allocation9_spill]] }
 0xdfc   : > { %p27_p2 = scmp.ge.s32.totalorder %s3592_s27, 4  }
 0xdfd   : > { %s3596_s25 = smov %s3593_s28 }
 0xdfe   :  { %29 = sbr.rel (!%p27_p2) target bundleno = 10 (0xa), region = 123 }
 0xe03   :  { %2547 = vsyncpa [#allocation4], 1 }
 0xe04   :  { %2549 = vsyncpa [#allocation4 + $0x1], 1 }

</bundles_post_ra>
